<compile_context>
chip_gen: v5e
topology: v5e:2x2
jax: 0.10.0
libtpu: 0.0.40
codegen_flags: <defaults>
</compile_context>

<pallas_src>
import functools
import math

import numpy as np
import jax
import jax.numpy as jnp
from jax.experimental import pallas as pl
from jax.experimental.pallas import tpu as pltpu


def _round_up(v, m):
    return (v + m - 1) // m * m


# ----------------------------------------------------------------------------
# Fused kernel
# ----------------------------------------------------------------------------
def fused_cnn_kernel(*refs, n_batch, conv_meta, n_fc, eps=1e-5):
    """Whole-network forward pass (all operands resident in VMEM).

    Operand order:
      x_slab                               (C0_pad, W0)  batch packed on lanes
      per conv layer (not last): w2 (Cout_pad, K*Cin_pad), gamma (Cout_pad, 1),
                                 beta (Cout_pad, 1), bn_mask (1, Q),
                                 pool_sel (R, W_next)
      last conv layer:           w2, gamma, beta, bn_mask,
                                 a_rep (F_pad, Cout_pad), j_mask (F_pad, R),
                                 b_sel (R, N)
      per fc layer:              w (out_pad, in_pad), b (out_pad, 1)
      out_ref                              (n_out, N)

    conv_meta: static tuple per layer (K, Li, Lc, Lp, pk, ps, Q, R) where
      Li = per-batch input length, Lc = conv output length, Lp = pool output
      length, Q = lane-padded conv/BN width (multiple of 128), R = Q - pk + 1.
    """
    n_conv = len(conv_meta)
    idx = 0
    x_ref = refs[idx]; idx += 1
    conv_refs = []
    for layer in range(n_conv):
        take = 7 if layer == n_conv - 1 else 5
        conv_refs.append(refs[idx:idx + take]); idx += take
    fc_refs = []
    for _ in range(n_fc):
        fc_refs.append(refs[idx:idx + 2]); idx += 2
    out_ref = refs[idx]

    slab = x_ref[...]          # (Cin_pad, W): zeros outside valid batch segments
    hflat = None

    for layer, (K, Li, Lc, Lp, pk, ps, Q, R) in enumerate(conv_meta):
        last = layer == n_conv - 1
        if last:
            w_ref, g_ref, be_ref, m_ref, ar_ref, jm_ref, bs_ref = conv_refs[layer]
        else:
            w_ref, g_ref, be_ref, m_ref, s_ref = conv_refs[layer]

        # ---- Conv1d: im2col via K lane-shifted slices (slab width >= Q+K-1 by
        #      construction -> no zero-pad copy), one MXU matmul for the whole
        #      batch.  Conv bias omitted: cancels under training-mode BN.
        patch = jnp.concatenate([slab[:, k:k + Q] for k in range(K)], axis=0)
        y = jnp.dot(w_ref[...], patch, preferred_element_type=jnp.float32)

        # ---- BatchNorm1d (training stats over the N*Lc valid columns),
        #      single pass: var = E[y^2] - mean^2, fused affine + ReLU.
        mask = m_ref[...]                                   # (1, Q)
        inv_cnt = 1.0 / float(n_batch * Lc)
        ym = y * mask
        s1 = jnp.sum(ym, axis=-1, keepdims=True)
        s2 = jnp.sum(ym * y, axis=-1, keepdims=True)
        mean = s1 * inv_cnt
        var = jnp.maximum(s2 * inv_cnt - mean * mean, 0.0)
        scale = g_ref[...] * jax.lax.rsqrt(var + eps)       # (Cout_pad, 1)
        shift = be_ref[...] - mean * scale
        z = jnp.maximum(y * scale + shift, 0.0)             # (Cout_pad, Q)

        # ---- MaxPool1d: (pk-1) shifted elementwise maxima (R = Q - pk + 1, so
        #      slices stay in-bounds), strided window selection done by a
        #      constant 0/1 matmul (MXU is idle anyway).
        zmax = z[:, 0:R]
        for k in range(1, pk):
            zmax = jnp.maximum(zmax, z[:, k:k + R])

        if not last:
            # repack (Cout_pad, R) -> next lane-padded slab (Cout_pad, W_next)
            slab = jnp.dot(zmax, s_ref[...], preferred_element_type=jnp.float32)
        else:
            # fused flatten (no per-row slices / reshapes / transposes):
            #   hflat[c*Lp + j, n] = zmax[c, n*Li + j*ps]
            rep = jnp.dot(ar_ref[...], zmax, preferred_element_type=jnp.float32)
            hflat = jnp.dot(rep * jm_ref[...], bs_ref[...],
                            preferred_element_type=jnp.float32)   # (F_pad, N)

    # ---- FC head in transposed layout (features on sublanes, batch on lanes);
    #      PyTorch (out, in) weights are used without any re-layout.
    h = hflat
    for i, (w_ref, b_ref) in enumerate(fc_refs):
        h = jnp.dot(w_ref[...], h, preferred_element_type=jnp.float32) + b_ref[...]
        if i != n_fc - 1:
            h = jnp.maximum(h, 0.0)
    out_ref[...] = h                                        # (n_out, N)


# ----------------------------------------------------------------------------
# Init: every layout transform, padding, mask and selector hoisted to init time
# ----------------------------------------------------------------------------
def init_model(key, n_batch, input_c, input_s, conv_c, conv_k, pool_k, pool_s,
               line_h, n_out=2):
    operands = []
    conv_meta = []

    cin, cin_pad, li = input_c, _round_up(input_c, 8), input_s
    n_conv = len(conv_c)
    w0 = None
    f_pad = None

    for idx, (cout, K) in enumerate(zip(conv_c, conv_k)):
        cout_pad = _round_up(cout, 8)
        lc = li - K + 1                               # conv: stride=1, pad=0
        lp = (lc - pool_k) // pool_s + 1              # pool: floor mode, pad=0
        if lc < 1 or lp < 1:
            raise ValueError("feature map too small")
        q = _round_up(n_batch * li, 128)              # lane-dense conv/BN width
        r = q - pool_k + 1                            # pool-max width
        w_in = _round_up(q + K - 1, 128)              # slab width feeding layer
        if idx == 0:
            w0 = w_in

        key, kw = jax.random.split(key)
        bound = 1.0 / math.sqrt(cin * K)
        w = jax.random.uniform(kw, (cout, cin, K), jnp.float32, -bound, bound)
        # Conv bias is intentionally not created/used: training-mode BN
        # subtracts the batch mean, which cancels it exactly.
        w2 = np.zeros((cout_pad, K * cin_pad), np.float32)
        w2[:cout].reshape(cout, K, cin_pad)[:, :, :cin] = np.transpose(
            np.asarray(w), (0, 2, 1))
        gamma = np.zeros((cout_pad, 1), np.float32); gamma[:cout] = 1.0
        beta = np.zeros((cout_pad, 1), np.float32)

        bn_mask = np.zeros((1, q), np.float32)
        for n in range(n_batch):
            bn_mask[0, n * li:n * li + lc] = 1.0

        layer_ops = [w2, gamma, beta, bn_mask]
        if idx != n_conv - 1:
            k_next = conv_k[idx + 1]
            q_next = _round_up(n_batch * lp, 128)
            w_next = _round_up(q_next + k_next - 1, 128)
            sel = np.zeros((r, w_next), np.float32)
            for n in range(n_batch):
                for j in range(lp):
                    sel[n * li + j * pool_s, n * lp + j] = 1.0
            layer_ops.append(sel)
        else:
            feat = cout * lp                          # torch in_features = C*Lp
            f_pad = _round_up(feat, 8)
            a_rep = np.zeros((f_pad, cout_pad), np.float32)
            j_mask = np.zeros((f_pad, r), np.float32)
            b_sel = np.zeros((r, n_batch), np.float32)
            for c in range(cout):
                for j in range(lp):
                    a_rep[c * lp + j, c] = 1.0
                    for n in range(n_batch):
                        j_mask[c * lp + j, n * li + j * pool_s] = 1.0
            for n in range(n_batch):
                for j in range(lp):
                    b_sel[n * li + j * pool_s, n] = 1.0
            layer_ops += [a_rep, j_mask, b_sel]
        operands += layer_ops
        conv_meta.append((K, li, lc, lp, pool_k, pool_s, q, r))
        cin, cin_pad, li = cout, cout_pad, lp

    # FC head: weights kept in (out, in) layout (transposed-head kernel),
    # zero-padded to the padded feature dims.
    in_f, in_pad = conv_c[-1] * li, f_pad
    fc_dims = list(line_h) + [n_out]
    for i, out_dim in enumerate(fc_dims):
        key, kw, kb = jax.random.split(key, 3)
        bound = 1.0 / math.sqrt(in_f)
        w = jax.random.uniform(kw, (out_dim, in_f), jnp.float32, -bound, bound)
        b = jax.random.uniform(kb, (out_dim,), jnp.float32, -bound, bound)
        out_pad = out_dim if i == len(fc_dims) - 1 else _round_up(out_dim, 8)
        wp = np.zeros((out_pad, in_pad), np.float32)
        wp[:out_dim, :in_f] = np.asarray(w)
        bp = np.zeros((out_pad, 1), np.float32)
        bp[:out_dim, 0] = np.asarray(b)
        operands += [wp, bp]
        in_f, in_pad = out_dim, out_pad

    operands = [jnp.asarray(o) for o in operands]
    meta = dict(n_batch=n_batch, n_out=n_out, n_fc=len(fc_dims),
                conv_meta=tuple(conv_meta), c0=input_c,
                c0_pad=_round_up(input_c, 8), w0=w0, l0=input_s)
    return operands, meta


# ----------------------------------------------------------------------------
# Wrapper
# ----------------------------------------------------------------------------
_VMEM = pl.BlockSpec(memory_space=pltpu.MemorySpace.VMEM)


def make_forward(meta):
    kern = functools.partial(fused_cnn_kernel, n_batch=meta["n_batch"],
                             conv_meta=meta["conv_meta"], n_fc=meta["n_fc"])
    n, l0 = meta["n_batch"], meta["l0"]
    c0, c0_pad, w0 = meta["c0"], meta["c0_pad"], meta["w0"]
    n_out = meta["n_out"]

    @jax.jit
    def forward(x, operands):
        # Batch packed along the lane axis + (8,128) padding done in the
        # wrapper, so the relayout happens while preparing the pallas_call
        # operand rather than inside the serial kernel.
        slab = jnp.transpose(x, (1, 0, 2)).reshape(c0, n * l0)
        slab = jnp.pad(slab, ((0, c0_pad - c0), (0, w0 - n * l0)))
        ops = [slab] + list(operands)
        out_t = pl.pallas_call(
            kern,
            out_shape=jax.ShapeDtypeStruct((n_out, n), jnp.float32),
            in_specs=[_VMEM] * len(ops),
            out_specs=_VMEM,
        )(*ops)
        return out_t.T                       # (N, n_out), matches the module
    return forward


# ----------------------------------------------------------------------------
if __name__ == "__main__":
    key = jax.random.PRNGKey(0)
    k_param, k_x = jax.random.split(key)

    # Small config consistent with the module's constructor signature.
    N = 2
    input_c = 4
    input_s = 128
    conv_c = (6, 6, 6)
    conv_k = (16, 6, 6)
    pool_k = 4
    pool_s = 2
    line_h = [32]

    operands, meta = init_model(k_param, N, input_c, input_s, conv_c, conv_k,
                                pool_k, pool_s, line_h)
    forward = make_forward(meta)

    x = jax.random.normal(k_x, (N, input_c, input_s), jnp.float32)

    out = jax.block_until_ready(forward(x, operands))
    assert out.shape == (N, 2), out.shape
    assert bool(jnp.all(jnp.isfinite(out)))
    print("KERNEL_OK")
</pallas_src>

<mosaic_0001>
module attributes {stable_mosaic.version = 11 : i64} {
  func.func @fused_cnn_kernel(%arg0: memref<8x384xf32, #tpu.memory_space<vmem>>, %arg1: memref<8x128xf32, #tpu.memory_space<vmem>>, %arg2: memref<8x1xf32, #tpu.memory_space<vmem>>, %arg3: memref<8x1xf32, #tpu.memory_space<vmem>>, %arg4: memref<1x256xf32, #tpu.memory_space<vmem>>, %arg5: memref<253x256xf32, #tpu.memory_space<vmem>>, %arg6: memref<8x48xf32, #tpu.memory_space<vmem>>, %arg7: memref<8x1xf32, #tpu.memory_space<vmem>>, %arg8: memref<8x1xf32, #tpu.memory_space<vmem>>, %arg9: memref<1x128xf32, #tpu.memory_space<vmem>>, %arg10: memref<125x256xf32, #tpu.memory_space<vmem>>, %arg11: memref<8x48xf32, #tpu.memory_space<vmem>>, %arg12: memref<8x1xf32, #tpu.memory_space<vmem>>, %arg13: memref<8x1xf32, #tpu.memory_space<vmem>>, %arg14: memref<1x128xf32, #tpu.memory_space<vmem>>, %arg15: memref<48x8xf32, #tpu.memory_space<vmem>>, %arg16: memref<48x125xf32, #tpu.memory_space<vmem>>, %arg17: memref<125x2xf32, #tpu.memory_space<vmem>>, %arg18: memref<32x48xf32, #tpu.memory_space<vmem>>, %arg19: memref<32x1xf32, #tpu.memory_space<vmem>>, %arg20: memref<2x32xf32, #tpu.memory_space<vmem>>, %arg21: memref<2x1xf32, #tpu.memory_space<vmem>>, %arg22: memref<2x2xf32, #tpu.memory_space<vmem>>) attributes {dimension_semantics = [], scalar_prefetch = 0 : i64, scratch_operands = 0 : i64, tpu.core_type = #tpu.core_type<tc>} {
    %c0 = arith.constant 0 : index
    %c0_0 = arith.constant 0 : index
    %0 = vector.load %arg0[%c0, %c0_0] : memref<8x384xf32, #tpu.memory_space<vmem>>, vector<8x384xf32>
    %1 = vector.extract_strided_slice %0 {offsets = [0, 0], sizes = [8, 256], strides = [1, 1]} : vector<8x384xf32> to vector<8x256xf32>
    %2 = vector.extract_strided_slice %0 {offsets = [0, 1], sizes = [8, 256], strides = [1, 1]} : vector<8x384xf32> to vector<8x256xf32>
    %3 = vector.extract_strided_slice %0 {offsets = [0, 2], sizes = [8, 256], strides = [1, 1]} : vector<8x384xf32> to vector<8x256xf32>
    %4 = vector.extract_strided_slice %0 {offsets = [0, 3], sizes = [8, 256], strides = [1, 1]} : vector<8x384xf32> to vector<8x256xf32>
    %5 = vector.extract_strided_slice %0 {offsets = [0, 4], sizes = [8, 256], strides = [1, 1]} : vector<8x384xf32> to vector<8x256xf32>
    %6 = vector.extract_strided_slice %0 {offsets = [0, 5], sizes = [8, 256], strides = [1, 1]} : vector<8x384xf32> to vector<8x256xf32>
    %7 = vector.extract_strided_slice %0 {offsets = [0, 6], sizes = [8, 256], strides = [1, 1]} : vector<8x384xf32> to vector<8x256xf32>
    %8 = vector.extract_strided_slice %0 {offsets = [0, 7], sizes = [8, 256], strides = [1, 1]} : vector<8x384xf32> to vector<8x256xf32>
    %9 = vector.extract_strided_slice %0 {offsets = [0, 8], sizes = [8, 256], strides = [1, 1]} : vector<8x384xf32> to vector<8x256xf32>
    %10 = vector.extract_strided_slice %0 {offsets = [0, 9], sizes = [8, 256], strides = [1, 1]} : vector<8x384xf32> to vector<8x256xf32>
    %11 = vector.extract_strided_slice %0 {offsets = [0, 10], sizes = [8, 256], strides = [1, 1]} : vector<8x384xf32> to vector<8x256xf32>
    %12 = vector.extract_strided_slice %0 {offsets = [0, 11], sizes = [8, 256], strides = [1, 1]} : vector<8x384xf32> to vector<8x256xf32>
    %13 = vector.extract_strided_slice %0 {offsets = [0, 12], sizes = [8, 256], strides = [1, 1]} : vector<8x384xf32> to vector<8x256xf32>
    %14 = vector.extract_strided_slice %0 {offsets = [0, 13], sizes = [8, 256], strides = [1, 1]} : vector<8x384xf32> to vector<8x256xf32>
    %15 = vector.extract_strided_slice %0 {offsets = [0, 14], sizes = [8, 256], strides = [1, 1]} : vector<8x384xf32> to vector<8x256xf32>
    %16 = vector.extract_strided_slice %0 {offsets = [0, 15], sizes = [8, 256], strides = [1, 1]} : vector<8x384xf32> to vector<8x256xf32>
    %17 = tpu.concatenate %1, %2, %3, %4, %5, %6, %7, %8, %9, %10, %11, %12, %13, %14, %15, %16 in 0 : vector<8x256xf32>, vector<8x256xf32>, vector<8x256xf32>, vector<8x256xf32>, vector<8x256xf32>, vector<8x256xf32>, vector<8x256xf32>, vector<8x256xf32>, vector<8x256xf32>, vector<8x256xf32>, vector<8x256xf32>, vector<8x256xf32>, vector<8x256xf32>, vector<8x256xf32>, vector<8x256xf32>, vector<8x256xf32> -> vector<128x256xf32>
    %c0_1 = arith.constant 0 : index
    %c0_2 = arith.constant 0 : index
    %18 = vector.load %arg1[%c0_1, %c0_2] : memref<8x128xf32, #tpu.memory_space<vmem>>, vector<8x128xf32>
    %cst = arith.constant dense<0.000000e+00> : vector<8x256xf32>
    %19 = tpu.matmul %18, %17, %cst {dimension_numbers = #tpu.dot_dimension_numbers<[1], [0], [0], [1], [0, 0, 1, 1], [], []>} : vector<8x128xf32>, vector<128x256xf32>, vector<8x256xf32> -> vector<8x256xf32>
    %c0_3 = arith.constant 0 : index
    %c0_4 = arith.constant 0 : index
    %20 = vector.load %arg4[%c0_3, %c0_4] : memref<1x256xf32, #tpu.memory_space<vmem>>, vector<1x256xf32>
    %21 = vector.broadcast %20 : vector<1x256xf32> to vector<8x256xf32>
    %22 = arith.mulf %19, %21 : vector<8x256xf32>
    %cst_5 = arith.constant dense<0.000000e+00> : vector<8xf32>
    %23 = vector.multi_reduction <add>, %22, %cst_5 [1] : vector<8x256xf32> to vector<8xf32>
    %24 = vector.shape_cast %23 : vector<8xf32> to vector<8x1xf32>
    %25 = arith.mulf %22, %19 : vector<8x256xf32>
    %cst_6 = arith.constant dense<0.000000e+00> : vector<8xf32>
    %26 = vector.multi_reduction <add>, %25, %cst_6 [1] : vector<8x256xf32> to vector<8xf32>
    %27 = vector.shape_cast %26 : vector<8xf32> to vector<8x1xf32>
    %cst_7 = arith.constant 0.00442477874 : f32
    %28 = vector.broadcast %cst_7 : f32 to vector<8x1xf32>
    %29 = arith.mulf %24, %28 : vector<8x1xf32>
    %cst_8 = arith.constant 0.00442477874 : f32
    %30 = vector.broadcast %cst_8 : f32 to vector<8x1xf32>
    %31 = arith.mulf %27, %30 : vector<8x1xf32>
    %32 = arith.mulf %29, %29 : vector<8x1xf32>
    %33 = arith.subf %31, %32 : vector<8x1xf32>
    %cst_9 = arith.constant 0.000000e+00 : f32
    %34 = vector.broadcast %cst_9 : f32 to vector<8x1xf32>
    %35 = arith.maximumf %33, %34 : vector<8x1xf32>
    %c0_10 = arith.constant 0 : index
    %c0_11 = arith.constant 0 : index
    %36 = vector.load %arg2[%c0_10, %c0_11] : memref<8x1xf32, #tpu.memory_space<vmem>>, vector<8x1xf32>
    %cst_12 = arith.constant 9.99999974E-6 : f32
    %37 = vector.broadcast %cst_12 : f32 to vector<8x1xf32>
    %38 = arith.addf %35, %37 : vector<8x1xf32>
    %39 = math.rsqrt %38 : vector<8x1xf32>
    %40 = arith.mulf %36, %39 : vector<8x1xf32>
    %c0_13 = arith.constant 0 : index
    %c0_14 = arith.constant 0 : index
    %41 = vector.load %arg3[%c0_13, %c0_14] : memref<8x1xf32, #tpu.memory_space<vmem>>, vector<8x1xf32>
    %42 = arith.mulf %29, %40 : vector<8x1xf32>
    %43 = arith.subf %41, %42 : vector<8x1xf32>
    %44 = vector.broadcast %40 : vector<8x1xf32> to vector<8x256xf32>
    %45 = arith.mulf %19, %44 : vector<8x256xf32>
    %46 = vector.broadcast %43 : vector<8x1xf32> to vector<8x256xf32>
    %47 = arith.addf %45, %46 : vector<8x256xf32>
    %cst_15 = arith.constant 0.000000e+00 : f32
    %48 = vector.broadcast %cst_15 : f32 to vector<8x256xf32>
    %49 = arith.maximumf %47, %48 : vector<8x256xf32>
    %50 = vector.extract_strided_slice %49 {offsets = [0, 0], sizes = [8, 253], strides = [1, 1]} : vector<8x256xf32> to vector<8x253xf32>
    %51 = vector.extract_strided_slice %49 {offsets = [0, 1], sizes = [8, 253], strides = [1, 1]} : vector<8x256xf32> to vector<8x253xf32>
    %52 = arith.maximumf %50, %51 : vector<8x253xf32>
    %53 = vector.extract_strided_slice %49 {offsets = [0, 2], sizes = [8, 253], strides = [1, 1]} : vector<8x256xf32> to vector<8x253xf32>
    %54 = arith.maximumf %52, %53 : vector<8x253xf32>
    %55 = vector.extract_strided_slice %49 {offsets = [0, 3], sizes = [8, 253], strides = [1, 1]} : vector<8x256xf32> to vector<8x253xf32>
    %56 = arith.maximumf %54, %55 : vector<8x253xf32>
    %c0_16 = arith.constant 0 : index
    %c0_17 = arith.constant 0 : index
    %57 = vector.load %arg5[%c0_16, %c0_17] : memref<253x256xf32, #tpu.memory_space<vmem>>, vector<253x256xf32>
    %cst_18 = arith.constant dense<0.000000e+00> : vector<8x256xf32>
    %58 = tpu.matmul %56, %57, %cst_18 {dimension_numbers = #tpu.dot_dimension_numbers<[1], [0], [0], [1], [0, 0, 1, 1], [], []>} : vector<8x253xf32>, vector<253x256xf32>, vector<8x256xf32> -> vector<8x256xf32>
    %59 = vector.extract_strided_slice %58 {offsets = [0, 0], sizes = [8, 128], strides = [1, 1]} : vector<8x256xf32> to vector<8x128xf32>
    %60 = vector.extract_strided_slice %58 {offsets = [0, 1], sizes = [8, 128], strides = [1, 1]} : vector<8x256xf32> to vector<8x128xf32>
    %61 = vector.extract_strided_slice %58 {offsets = [0, 2], sizes = [8, 128], strides = [1, 1]} : vector<8x256xf32> to vector<8x128xf32>
    %62 = vector.extract_strided_slice %58 {offsets = [0, 3], sizes = [8, 128], strides = [1, 1]} : vector<8x256xf32> to vector<8x128xf32>
    %63 = vector.extract_strided_slice %58 {offsets = [0, 4], sizes = [8, 128], strides = [1, 1]} : vector<8x256xf32> to vector<8x128xf32>
    %64 = vector.extract_strided_slice %58 {offsets = [0, 5], sizes = [8, 128], strides = [1, 1]} : vector<8x256xf32> to vector<8x128xf32>
    %65 = tpu.concatenate %59, %60, %61, %62, %63, %64 in 0 : vector<8x128xf32>, vector<8x128xf32>, vector<8x128xf32>, vector<8x128xf32>, vector<8x128xf32>, vector<8x128xf32> -> vector<48x128xf32>
    %c0_19 = arith.constant 0 : index
    %c0_20 = arith.constant 0 : index
    %66 = vector.load %arg6[%c0_19, %c0_20] : memref<8x48xf32, #tpu.memory_space<vmem>>, vector<8x48xf32>
    %cst_21 = arith.constant dense<0.000000e+00> : vector<8x128xf32>
    %67 = tpu.matmul %66, %65, %cst_21 {dimension_numbers = #tpu.dot_dimension_numbers<[1], [0], [0], [1], [0, 0, 1, 1], [], []>} : vector<8x48xf32>, vector<48x128xf32>, vector<8x128xf32> -> vector<8x128xf32>
    %c0_22 = arith.constant 0 : index
    %c0_23 = arith.constant 0 : index
    %68 = vector.load %arg9[%c0_22, %c0_23] : memref<1x128xf32, #tpu.memory_space<vmem>>, vector<1x128xf32>
    %69 = vector.broadcast %68 : vector<1x128xf32> to vector<8x128xf32>
    %70 = arith.mulf %67, %69 : vector<8x128xf32>
    %cst_24 = arith.constant dense<0.000000e+00> : vector<8xf32>
    %71 = vector.multi_reduction <add>, %70, %cst_24 [1] : vector<8x128xf32> to vector<8xf32>
    %72 = vector.shape_cast %71 : vector<8xf32> to vector<8x1xf32>
    %73 = arith.mulf %70, %67 : vector<8x128xf32>
    %cst_25 = arith.constant dense<0.000000e+00> : vector<8xf32>
    %74 = vector.multi_reduction <add>, %73, %cst_25 [1] : vector<8x128xf32> to vector<8xf32>
    %75 = vector.shape_cast %74 : vector<8xf32> to vector<8x1xf32>
    %cst_26 = arith.constant 0.00999999977 : f32
    %76 = vector.broadcast %cst_26 : f32 to vector<8x1xf32>
    %77 = arith.mulf %72, %76 : vector<8x1xf32>
    %cst_27 = arith.constant 0.00999999977 : f32
    %78 = vector.broadcast %cst_27 : f32 to vector<8x1xf32>
    %79 = arith.mulf %75, %78 : vector<8x1xf32>
    %80 = arith.mulf %77, %77 : vector<8x1xf32>
    %81 = arith.subf %79, %80 : vector<8x1xf32>
    %cst_28 = arith.constant 0.000000e+00 : f32
    %82 = vector.broadcast %cst_28 : f32 to vector<8x1xf32>
    %83 = arith.maximumf %81, %82 : vector<8x1xf32>
    %c0_29 = arith.constant 0 : index
    %c0_30 = arith.constant 0 : index
    %84 = vector.load %arg7[%c0_29, %c0_30] : memref<8x1xf32, #tpu.memory_space<vmem>>, vector<8x1xf32>
    %cst_31 = arith.constant 9.99999974E-6 : f32
    %85 = vector.broadcast %cst_31 : f32 to vector<8x1xf32>
    %86 = arith.addf %83, %85 : vector<8x1xf32>
    %87 = math.rsqrt %86 : vector<8x1xf32>
    %88 = arith.mulf %84, %87 : vector<8x1xf32>
    %c0_32 = arith.constant 0 : index
    %c0_33 = arith.constant 0 : index
    %89 = vector.load %arg8[%c0_32, %c0_33] : memref<8x1xf32, #tpu.memory_space<vmem>>, vector<8x1xf32>
    %90 = arith.mulf %77, %88 : vector<8x1xf32>
    %91 = arith.subf %89, %90 : vector<8x1xf32>
    %92 = vector.broadcast %88 : vector<8x1xf32> to vector<8x128xf32>
    %93 = arith.mulf %67, %92 : vector<8x128xf32>
    %94 = vector.broadcast %91 : vector<8x1xf32> to vector<8x128xf32>
    %95 = arith.addf %93, %94 : vector<8x128xf32>
    %cst_34 = arith.constant 0.000000e+00 : f32
    %96 = vector.broadcast %cst_34 : f32 to vector<8x128xf32>
    %97 = arith.maximumf %95, %96 : vector<8x128xf32>
    %98 = vector.extract_strided_slice %97 {offsets = [0, 0], sizes = [8, 125], strides = [1, 1]} : vector<8x128xf32> to vector<8x125xf32>
    %99 = vector.extract_strided_slice %97 {offsets = [0, 1], sizes = [8, 125], strides = [1, 1]} : vector<8x128xf32> to vector<8x125xf32>
    %100 = arith.maximumf %98, %99 : vector<8x125xf32>
    %101 = vector.extract_strided_slice %97 {offsets = [0, 2], sizes = [8, 125], strides = [1, 1]} : vector<8x128xf32> to vector<8x125xf32>
    %102 = arith.maximumf %100, %101 : vector<8x125xf32>
    %103 = vector.extract_strided_slice %97 {offsets = [0, 3], sizes = [8, 125], strides = [1, 1]} : vector<8x128xf32> to vector<8x125xf32>
    %104 = arith.maximumf %102, %103 : vector<8x125xf32>
    %c0_35 = arith.constant 0 : index
    %c0_36 = arith.constant 0 : index
    %105 = vector.load %arg10[%c0_35, %c0_36] : memref<125x256xf32, #tpu.memory_space<vmem>>, vector<125x256xf32>
    %cst_37 = arith.constant dense<0.000000e+00> : vector<8x256xf32>
    %106 = tpu.matmul %104, %105, %cst_37 {dimension_numbers = #tpu.dot_dimension_numbers<[1], [0], [0], [1], [0, 0, 1, 1], [], []>} : vector<8x125xf32>, vector<125x256xf32>, vector<8x256xf32> -> vector<8x256xf32>
    %107 = vector.extract_strided_slice %106 {offsets = [0, 0], sizes = [8, 128], strides = [1, 1]} : vector<8x256xf32> to vector<8x128xf32>
    %108 = vector.extract_strided_slice %106 {offsets = [0, 1], sizes = [8, 128], strides = [1, 1]} : vector<8x256xf32> to vector<8x128xf32>
    %109 = vector.extract_strided_slice %106 {offsets = [0, 2], sizes = [8, 128], strides = [1, 1]} : vector<8x256xf32> to vector<8x128xf32>
    %110 = vector.extract_strided_slice %106 {offsets = [0, 3], sizes = [8, 128], strides = [1, 1]} : vector<8x256xf32> to vector<8x128xf32>
    %111 = vector.extract_strided_slice %106 {offsets = [0, 4], sizes = [8, 128], strides = [1, 1]} : vector<8x256xf32> to vector<8x128xf32>
    %112 = vector.extract_strided_slice %106 {offsets = [0, 5], sizes = [8, 128], strides = [1, 1]} : vector<8x256xf32> to vector<8x128xf32>
    %113 = tpu.concatenate %107, %108, %109, %110, %111, %112 in 0 : vector<8x128xf32>, vector<8x128xf32>, vector<8x128xf32>, vector<8x128xf32>, vector<8x128xf32>, vector<8x128xf32> -> vector<48x128xf32>
    %c0_38 = arith.constant 0 : index
    %c0_39 = arith.constant 0 : index
    %114 = vector.load %arg11[%c0_38, %c0_39] : memref<8x48xf32, #tpu.memory_space<vmem>>, vector<8x48xf32>
    %cst_40 = arith.constant dense<0.000000e+00> : vector<8x128xf32>
    %115 = tpu.matmul %114, %113, %cst_40 {dimension_numbers = #tpu.dot_dimension_numbers<[1], [0], [0], [1], [0, 0, 1, 1], [], []>} : vector<8x48xf32>, vector<48x128xf32>, vector<8x128xf32> -> vector<8x128xf32>
    %c0_41 = arith.constant 0 : index
    %c0_42 = arith.constant 0 : index
    %116 = vector.load %arg14[%c0_41, %c0_42] : memref<1x128xf32, #tpu.memory_space<vmem>>, vector<1x128xf32>
    %117 = vector.broadcast %116 : vector<1x128xf32> to vector<8x128xf32>
    %118 = arith.mulf %115, %117 : vector<8x128xf32>
    %cst_43 = arith.constant dense<0.000000e+00> : vector<8xf32>
    %119 = vector.multi_reduction <add>, %118, %cst_43 [1] : vector<8x128xf32> to vector<8xf32>
    %120 = vector.shape_cast %119 : vector<8xf32> to vector<8x1xf32>
    %121 = arith.mulf %118, %115 : vector<8x128xf32>
    %cst_44 = arith.constant dense<0.000000e+00> : vector<8xf32>
    %122 = vector.multi_reduction <add>, %121, %cst_44 [1] : vector<8x128xf32> to vector<8xf32>
    %123 = vector.shape_cast %122 : vector<8xf32> to vector<8x1xf32>
    %cst_45 = arith.constant 0.0263157897 : f32
    %124 = vector.broadcast %cst_45 : f32 to vector<8x1xf32>
    %125 = arith.mulf %120, %124 : vector<8x1xf32>
    %cst_46 = arith.constant 0.0263157897 : f32
    %126 = vector.broadcast %cst_46 : f32 to vector<8x1xf32>
    %127 = arith.mulf %123, %126 : vector<8x1xf32>
    %128 = arith.mulf %125, %125 : vector<8x1xf32>
    %129 = arith.subf %127, %128 : vector<8x1xf32>
    %cst_47 = arith.constant 0.000000e+00 : f32
    %130 = vector.broadcast %cst_47 : f32 to vector<8x1xf32>
    %131 = arith.maximumf %129, %130 : vector<8x1xf32>
    %c0_48 = arith.constant 0 : index
    %c0_49 = arith.constant 0 : index
    %132 = vector.load %arg12[%c0_48, %c0_49] : memref<8x1xf32, #tpu.memory_space<vmem>>, vector<8x1xf32>
    %cst_50 = arith.constant 9.99999974E-6 : f32
    %133 = vector.broadcast %cst_50 : f32 to vector<8x1xf32>
    %134 = arith.addf %131, %133 : vector<8x1xf32>
    %135 = math.rsqrt %134 : vector<8x1xf32>
    %136 = arith.mulf %132, %135 : vector<8x1xf32>
    %c0_51 = arith.constant 0 : index
    %c0_52 = arith.constant 0 : index
    %137 = vector.load %arg13[%c0_51, %c0_52] : memref<8x1xf32, #tpu.memory_space<vmem>>, vector<8x1xf32>
    %138 = arith.mulf %125, %136 : vector<8x1xf32>
    %139 = arith.subf %137, %138 : vector<8x1xf32>
    %140 = vector.broadcast %136 : vector<8x1xf32> to vector<8x128xf32>
    %141 = arith.mulf %115, %140 : vector<8x128xf32>
    %142 = vector.broadcast %139 : vector<8x1xf32> to vector<8x128xf32>
    %143 = arith.addf %141, %142 : vector<8x128xf32>
    %cst_53 = arith.constant 0.000000e+00 : f32
    %144 = vector.broadcast %cst_53 : f32 to vector<8x128xf32>
    %145 = arith.maximumf %143, %144 : vector<8x128xf32>
    %146 = vector.extract_strided_slice %145 {offsets = [0, 0], sizes = [8, 125], strides = [1, 1]} : vector<8x128xf32> to vector<8x125xf32>
    %147 = vector.extract_strided_slice %145 {offsets = [0, 1], sizes = [8, 125], strides = [1, 1]} : vector<8x128xf32> to vector<8x125xf32>
    %148 = arith.maximumf %146, %147 : vector<8x125xf32>
    %149 = vector.extract_strided_slice %145 {offsets = [0, 2], sizes = [8, 125], strides = [1, 1]} : vector<8x128xf32> to vector<8x125xf32>
    %150 = arith.maximumf %148, %149 : vector<8x125xf32>
    %151 = vector.extract_strided_slice %145 {offsets = [0, 3], sizes = [8, 125], strides = [1, 1]} : vector<8x128xf32> to vector<8x125xf32>
    %152 = arith.maximumf %150, %151 : vector<8x125xf32>
    %c0_54 = arith.constant 0 : index
    %c0_55 = arith.constant 0 : index
    %153 = vector.load %arg15[%c0_54, %c0_55] : memref<48x8xf32, #tpu.memory_space<vmem>>, vector<48x8xf32>
    %cst_56 = arith.constant dense<0.000000e+00> : vector<48x125xf32>
    %154 = tpu.matmul %153, %152, %cst_56 {dimension_numbers = #tpu.dot_dimension_numbers<[1], [0], [0], [1], [0, 0, 1, 1], [], []>} : vector<48x8xf32>, vector<8x125xf32>, vector<48x125xf32> -> vector<48x125xf32>
    %c0_57 = arith.constant 0 : index
    %c0_58 = arith.constant 0 : index
    %155 = vector.load %arg16[%c0_57, %c0_58] : memref<48x125xf32, #tpu.memory_space<vmem>>, vector<48x125xf32>
    %156 = arith.mulf %154, %155 : vector<48x125xf32>
    %c0_59 = arith.constant 0 : index
    %c0_60 = arith.constant 0 : index
    %157 = vector.load %arg17[%c0_59, %c0_60] : memref<125x2xf32, #tpu.memory_space<vmem>>, vector<125x2xf32>
    %cst_61 = arith.constant dense<0.000000e+00> : vector<48x2xf32>
    %158 = tpu.matmul %156, %157, %cst_61 {dimension_numbers = #tpu.dot_dimension_numbers<[1], [0], [0], [1], [0, 0, 1, 1], [], []>} : vector<48x125xf32>, vector<125x2xf32>, vector<48x2xf32> -> vector<48x2xf32>
    %c0_62 = arith.constant 0 : index
    %c0_63 = arith.constant 0 : index
    %159 = vector.load %arg18[%c0_62, %c0_63] : memref<32x48xf32, #tpu.memory_space<vmem>>, vector<32x48xf32>
    %cst_64 = arith.constant dense<0.000000e+00> : vector<32x2xf32>
    %160 = tpu.matmul %159, %158, %cst_64 {dimension_numbers = #tpu.dot_dimension_numbers<[1], [0], [0], [1], [0, 0, 1, 1], [], []>} : vector<32x48xf32>, vector<48x2xf32>, vector<32x2xf32> -> vector<32x2xf32>
    %c0_65 = arith.constant 0 : index
    %c0_66 = arith.constant 0 : index
    %161 = vector.load %arg19[%c0_65, %c0_66] : memref<32x1xf32, #tpu.memory_space<vmem>>, vector<32x1xf32>
    %162 = vector.broadcast %161 : vector<32x1xf32> to vector<32x2xf32>
    %163 = arith.addf %160, %162 : vector<32x2xf32>
    %cst_67 = arith.constant 0.000000e+00 : f32
    %164 = vector.broadcast %cst_67 : f32 to vector<32x2xf32>
    %165 = arith.maximumf %163, %164 : vector<32x2xf32>
    %c0_68 = arith.constant 0 : index
    %c0_69 = arith.constant 0 : index
    %166 = vector.load %arg20[%c0_68, %c0_69] : memref<2x32xf32, #tpu.memory_space<vmem>>, vector<2x32xf32>
    %cst_70 = arith.constant dense<0.000000e+00> : vector<2x2xf32>
    %167 = tpu.matmul %166, %165, %cst_70 {dimension_numbers = #tpu.dot_dimension_numbers<[1], [0], [0], [1], [0, 0, 1, 1], [], []>} : vector<2x32xf32>, vector<32x2xf32>, vector<2x2xf32> -> vector<2x2xf32>
    %c0_71 = arith.constant 0 : index
    %c0_72 = arith.constant 0 : index
    %168 = vector.load %arg21[%c0_71, %c0_72] : memref<2x1xf32, #tpu.memory_space<vmem>>, vector<2x1xf32>
    %169 = vector.broadcast %168 : vector<2x1xf32> to vector<2x2xf32>
    %170 = arith.addf %167, %169 : vector<2x2xf32>
    %c0_73 = arith.constant 0 : index
    %c0_74 = arith.constant 0 : index
    %171 = vector.load %arg22[%c0_73, %c0_74] : memref<2x2xf32, #tpu.memory_space<vmem>>, vector<2x2xf32>
    tpu.vector_store %arg22[%c0_73, %c0_74], %170 {strides = array<i32>} : memref<2x2xf32, #tpu.memory_space<vmem>>, vector<2x2xf32>,
    return
  }
}

</mosaic_0001>

<bundles_post_ra>
// kernel: forward.1
= control target key start
LH: loop header
LB: loop body
LE: loop exit
PB: predicated region body
PF: predicated region fallthrough
CT: control target
= control target key end

     0   :  { %s1758_s0 = inlined_call_operand.vmem [shape: f32[8,384], index: 0, kind: input, shape index: {}]   ;;  %s1759_s1 = inlined_call_operand.vmem [shape: f32[8,128], index: 1, kind: input, shape index: {}]   ;;  %s1760_s2 = inlined_call_operand.vmem [shape: f32[8,1], index: 2, kind: input, shape index: {}]   ;;  %s1761_s3 = inlined_call_operand.vmem [shape: f32[8,1], index: 3, kind: input, shape index: {}]   ;;  %s1762_s4 = inlined_call_operand.vmem [shape: f32[1,256], index: 4, kind: input, shape index: {}]   ;;  %s1763_s5 = inlined_call_operand.hbm [shape: f32[253,256], index: 5, kind: input, shape index: {}]   ;;  %s1764_s6 = inlined_call_operand.vmem [shape: f32[8,48], index: 6, kind: input, shape index: {}]   ;;  %s1765_s7 = inlined_call_operand.vmem [shape: f32[8,1], index: 7, kind: input, shape index: {}]   ;;  %s1766_s8 = inlined_call_operand.vmem [shape: f32[8,1], index: 8, kind: input, shape index: {}]   ;;  %s1767_s9 = inlined_call_operand.vmem [shape: f32[1,128], index: 9, kind: input, shape index: {}]   ;;  %s1768_s10 = inlined_call_operand.hbm [shape: f32[125,256], index: 10, kind: input, shape index: {}]   ;;  %s1769_s11 = inlined_call_operand.vmem [shape: f32[8,48], index: 11, kind: input, shape index: {}]   ;;  %s1770_s12 = inlined_call_operand.vmem [shape: f32[8,1], index: 12, kind: input, shape index: {}]   ;;  %s1771_s13 = inlined_call_operand.vmem [shape: f32[8,1], index: 13, kind: input, shape index: {}]   ;;  %s1772_s14 = inlined_call_operand.vmem [shape: f32[1,128], index: 14, kind: input, shape index: {}]   ;;  %s1773_s15 = inlined_call_operand.vmem [shape: f32[48,8], index: 15, kind: input, shape index: {}]   ;;  %s1774_s16 = inlined_call_operand.vmem [shape: f32[48,125], index: 16, kind: input, shape index: {}]   ;;  %s1775_s17 = inlined_call_operand.vmem [shape: f32[125,2], index: 17, kind: input, shape index: {}]   ;;  %s1776_s18 = inlined_call_operand.vmem [shape: f32[32,48], index: 18, kind: input, shape index: {}]   ;;  %s1777_s19 = inlined_call_operand.vmem [shape: f32[32,1], index: 19, kind: input, shape index: {}]   ;;  %s1778_s20 = inlined_call_operand.vmem [shape: f32[2,32], index: 20, kind: input, shape index: {}]   ;;  %s1779_s21 = inlined_call_operand.vmem [shape: f32[2,1], index: 21, kind: input, shape index: {}]   ;;  %s1780_s22 = inlined_call_operand.vmem [shape: f32[2,2], index: 22, kind: output, shape index: {}]  }
   0x1   :  { %1782 = sst [smem:[#allocation8_spill]] %s1758_s0 }
   0x2   :  { %1783 = sst [smem:[#allocation9_spill]] %s1759_s1 }
   0x3   :  { %1784 = sst [smem:[#allocation10_spill]] %s1760_s2 }
   0x4   :  { %1785 = sst [smem:[#allocation11_spill]] %s1761_s3 }
   0x5   :  { %1786 = sst [smem:[#allocation12_spill]] %s1762_s4 }
   0x6   :  { %1787 = sst [smem:[#allocation13_spill]] %s1763_s5 }
   0x7   :  { %1788 = sst [smem:[#allocation14_spill]] %s1764_s6 }
   0x8   :  { %27 = vsyncpa [#allocation3], 0  ;;  %s1789_s29 = sld [smem:[#allocation13_spill]] }
   0xe   :  { %s43_s30 = sshll.u32 %s1789_s29, 4  ;;  %s44_s30 = int_to_ptr.hbm [resolvable:$true] %s43_s30 }
   0xf   :  { %28 = vsyncpa [#allocation5], 0  ;;  %s1351_s4 = smov [#allocation2]   ;;  %s64_s5 = sshll.u32 %s1768_s10, 4  ;;  %s65_s5 = int_to_ptr.hbm [resolvable:$true] %s64_s5 }
  0x10   :  { %s45_s0 = sshll.u32 %s1351_s4, 4  ;;  %s1352_s24 = smov 256   ;;  %s46_s0 = int_to_ptr.vmem [resolvable:$true] %s45_s0 }
  0x11   :  { %s1353_s6 = smov 16   ;;  %s1354_s25 = smov [#allocation4]  }
  0x12   :  { %51 = dma.hbm_to_vmem [thread:$0]  %s44_s30, 8192, %s46_s0, [#allocation3], %s1352_s24, %s1352_s24, %s1353_s6  }
  0x13   :  { %s66_s26 = sshll.u32 %s1354_s25, 4  ;;  %s67_s26 = int_to_ptr.vmem [resolvable:$true] %s66_s26 }
  0x14   :  { %72 = dma.hbm_to_vmem [thread:$0]  %s65_s5, 4096, %s67_s26, [#allocation5], %s1352_s24, %s1352_s24, %s1353_s6  }
  0x15   :  { %1347 = dma.done.wait [#allocation3], 8192  }
  0x16   :  { %1348 = vsyncadd [#allocation3], 4294959104 }
  0x17   :  { %1349 = dma.done.wait [#allocation5], 4096  }
  0x18   :  { %1350 = vsyncadd [#allocation5], 4294963200  ;;  %s1790_s3 = sld [smem:[#allocation8_spill]]  ;;  %s1355_s10 = smov 114   ;;  %vm269_vm0 = vcmask 924672   ;;  %vm258_vm1 = vcmask 932864  }
  0x19   :  { %s1356_s30 = smov 113   ;;  %s1357_s4 = smov 115   ;;  %vm247_vm2 = vcmask 941056   ;;  %vm236_vm3 = vcmask 949248   ;;  %vm225_vm4 = vcmask 957440   ;;  %vm214_vm5 = vcmask 965632  }
  0x1a   :  { %s1358_s1 = smov 116   ;;  %s1359_s5 = smov 117   ;;  %vm203_vm6 = vcmask 973824   ;;  %vm192_vm7 = vcmask 982016   ;;  %vm181_vm8 = vcmask 990208   ;;  %vm170_vm9 = vcmask 998400  }
  0x1b   :  { %s1360_s24 = smov 118   ;;  %s1361_s6 = smov 119   ;;  %vm159_vm10 = vcmask 1006592   ;;  %vm148_vm11 = vcmask 1014784   ;;  %vm137_vm12 = vcmask 1022976   ;;  %vm126_vm13 = vcmask 1031168  }
  0x1c   :  { %s1362_s25 = smov 120   ;;  %s1363_s26 = smov 121   ;;  %vm115_vm14 = vcmask 1039360  }
  0x1d   :  { %s1364_s2 = smov 122   ;;  %s1365_s27 = smov 123  }
  0x1e   :  { %v1495_v0 = vld [vmem:[%s1790_s3] sm:$0xff]  ;;  %v1500_v1 = vld [vmem:[%s1790_s3 + $0x8] sm:$0xff]  ;;  %v105_v3 = vld [vmem:[%s1790_s3 + $0x10] sm:$0xff]  ;;  %s1366_s3 = smov 124   ;;  %s1367_s28 = smov 125  }
  0x1f   :  { %v1168_v2 = vpack.i.bf16 %v1500_v1, %v1495_v0  ;;  %s1368_s29 = smov 126   ;;  %s1791_s0 = sld [smem:[#allocation9_spill]] }
  0x20   :  { %s1795_s23 = sld [smem:[#allocation14_spill]] }
  0x21   :  { %1169 = vrot.lane.b32.xlu1 %v1168_v2, %s1355_s10  ;;  %1164 = vrot.lane.b32.xlu0 %v1168_v2, %s1356_s30 }
  0x22   :  { %1174 = vrot.lane.b32.xlu2 %v1168_v2, %s1357_s4 }
  0x29   :  { %256 = vrot.lane.b32.xlu1 %v105_v3, %s1355_s10  ;;  %267 = vrot.lane.b32.xlu0 %v105_v3, %s1356_s30  ;;  %s1369_s10 = smov 127   ;;  %s1794_s30 = sld [smem:[#allocation11_spill]] }
  0x2a   :  { %245 = vrot.lane.b32.xlu2 %v105_v3, %s1357_s4 }
  0x31   :  { %234 = vrot.lane.b32.xlu1 %v105_v3, %s1358_s1  ;;  %1179 = vrot.lane.b32.xlu0 %v1168_v2, %s1358_s1 }
  0x32   :  { %1184 = vrot.lane.b32.xlu2 %v1168_v2, %s1359_s5 }
  0x39   :  { %1189 = vrot.lane.b32.xlu1 %v1168_v2, %s1360_s24  ;;  %223 = vrot.lane.b32.xlu0 %v105_v3, %s1359_s5  ;;  %s1792_s5 = sld [smem:[#allocation12_spill]] }
  0x3a   :  { %212 = vrot.lane.b32.xlu2 %v105_v3, %s1360_s24 }
  0x41   :  { %201 = vrot.lane.b32.xlu1 %v105_v3, %s1361_s6  ;;  %1194 = vrot.lane.b32.xlu0 %v1168_v2, %s1361_s6 }
  0x42   :  { %1199 = vrot.lane.b32.xlu2 %v1168_v2, %s1362_s25 }
  0x49   :  { %1204 = vrot.lane.b32.xlu1 %v1168_v2, %s1363_s26  ;;  %190 = vrot.lane.b32.xlu0 %v105_v3, %s1362_s25  ;;  %s1793_s25 = sld [smem:[#allocation10_spill]] }
  0x4a   :  { %179 = vrot.lane.b32.xlu2 %v105_v3, %s1363_s26 }
  0x51   :  { %168 = vrot.lane.b32.xlu1 %v105_v3, %s1364_s2  ;;  %1209 = vrot.lane.b32.xlu0 %v1168_v2, %s1364_s2 }
  0x52   :  { %1214 = vrot.lane.b32.xlu2 %v1168_v2, %s1365_s27 }
  0x59   :  { %1219 = vrot.lane.b32.xlu1 %v1168_v2, %s1366_s3  ;;  %157 = vrot.lane.b32.xlu0 %v105_v3, %s1365_s27 }
  0x5a   :  { %146 = vrot.lane.b32.xlu2 %v105_v3, %s1366_s3 }
  0x61   :  { %135 = vrot.lane.b32.xlu1 %v105_v3, %s1367_s28  ;;  %1224 = vrot.lane.b32.xlu0 %v1168_v2, %s1367_s28 }
  0x62   :  { %1229 = vrot.lane.b32.xlu2 %v1168_v2, %s1368_s29 }
  0x69   :  { %1234 = vrot.lane.b32.xlu1 %v1168_v2, %s1369_s10  ;;  %124 = vrot.lane.b32.xlu0 %v105_v3, %s1368_s29 }
  0x6a   :  { %113 = vrot.lane.b32.xlu2 %v105_v3, %s1369_s10 }
  0x7c   :  { %v1175_v4 = vpop.permute.xlu2 %1174 }
  0x7d   :  { %v1177_v13 = vunpack.i.h.bf16 %v1175_v4  ;;  %v1176_v14 = vunpack.i.l.bf16 %v1175_v4 }
  0x7f   :  { %v248_v17 = vsel %vm247_vm2, %v1176_v14, %v1177_v13 }
  0x84   :  { %v246_v5 = vpop.permute.xlu2 %245 }
  0x85   :  { %v249_v23 = vsel %vm247_vm2, %v1177_v13, %v246_v5  ;;  %vm464_vm2 = vcmask 1044480  }
  0x8c   :  { %v1185_v6 = vpop.permute.xlu2 %1184 }
  0x8d   :  { %v1187_v24 = vunpack.i.h.bf16 %v1185_v6  ;;  %v1186_v25 = vunpack.i.l.bf16 %v1185_v6 }
  0x8f   :  { %v226_v32 = vsel %vm225_vm4, %v1186_v25, %v1187_v24 }
  0x93   :  { %v1170_v7 = vpop.permute.xlu1 %1169  ;;  %v1165_v8 = vpop.permute.xlu0 %1164 }
  0x94   :  { %v1172_v9 = vunpack.i.h.bf16 %v1170_v7  ;;  %v1171_v10 = vunpack.i.l.bf16 %v1170_v7  ;;  %v1167_v11 = vunpack.i.h.bf16 %v1165_v8  ;;  %v1166_v12 = vunpack.i.l.bf16 %v1165_v8  ;;  %v213_v21 = vpop.permute.xlu2 %212 }
  0x96   :  { %v270_v15 = vsel %vm269_vm0, %v1166_v12, %v1167_v11  ;;  %v259_v16 = vsel %vm258_vm1, %v1171_v10, %v1172_v9 }
  0x97   :  { %275 = vmatpush.msra.mxu0 %v270_v15 }
  0x99   :  { %276 = vmatpush.msra.mxu0 %v259_v16 }
  0x9b   :  { %v257_v18 = vpop.permute.xlu1 %256  ;;  %v268_v19 = vpop.permute.xlu0 %267  ;;  %277 = vmatpush.msra.mxu0 %v248_v17 }
  0x9c   :  { %v271_v20 = vsel %vm269_vm0, %v1167_v11, %v268_v19  ;;  %v260_v22 = vsel %vm258_vm1, %v1172_v9, %v257_v18  ;;  %v1200_v33 = vpop.permute.xlu2 %1199 }
  0x9d   :  { %295 = vmatpush.msra.mxu1 %v271_v20  ;;  %v1202_v42 = vunpack.i.h.bf16 %v1200_v33  ;;  %v1201_v43 = vunpack.i.l.bf16 %v1200_v33  ;;  %v315_v33 = vld [vmem:[%s1792_s5] sm:$0x3] }
  0x9f   :  { %296 = vmatpush.msra.mxu1 %v260_v22  ;;  %v193_v50 = vsel %vm192_vm7, %v1201_v43, %v1202_v42 }
  0xa1   :  { %297 = vmatpush.msra.mxu1 %v249_v23 }
  0xa3   :  { %v235_v26 = vpop.permute.xlu1 %234  ;;  %v1180_v27 = vpop.permute.xlu0 %1179 }
  0xa4   :  { %v1182_v28 = vunpack.i.h.bf16 %v1180_v27  ;;  %v1181_v29 = vunpack.i.l.bf16 %v1180_v27  ;;  %v180_v41 = vpop.permute.xlu2 %179 }
  0xa6   :  { %v237_v30 = vsel %vm236_vm3, %v1181_v29, %v1182_v28  ;;  %v238_v31 = vsel %vm236_vm3, %v1182_v28, %v235_v26  ;;  %vm584_vm3 = vcmask 392192  }
  0xa7   :  { %278 = vmatpush.msra.mxu0 %v237_v30  ;;  %298 = vmatpush.msra.mxu1 %v238_v31 }
  0xa9   :  { %279 = vmatpush.msra.mxu0 %v226_v32  ;;  %v274_v32 = vld [vmem:[%s1791_s0] sm:$0xff] }
  0xab   :  { %v1190_v34 = vpop.permute.xlu1 %1189  ;;  %v224_v35 = vpop.permute.xlu0 %223 }
  0xac   :  { %v1192_v36 = vunpack.i.h.bf16 %v1190_v34  ;;  %v1191_v37 = vunpack.i.l.bf16 %v1190_v34  ;;  %v227_v38 = vsel %vm225_vm4, %v1187_v24, %v224_v35  ;;  %v1215_v51 = vpop.permute.xlu2 %1214  ;;  %v317_v34 = vperm.slane %v315_v33, 0 }
  0xad   :  { %299 = vmatpush.msra.mxu1 %v227_v38  ;;  %v1217_v59 = vunpack.i.h.bf16 %v1215_v51  ;;  %v1216_v60 = vunpack.i.l.bf16 %v1215_v51  ;;  %v318_v35 = vperm.slane %v315_v33, 1  ;;  %v452_v33 = vld [vmem:[#allocation2 + $0x1b8] sm:$0xff] }
  0xae   :  { %v215_v39 = vsel %vm214_vm5, %v1191_v37, %v1192_v36  ;;  %v216_v40 = vsel %vm214_vm5, %v1192_v36, %v213_v21 }
  0xaf   :  { %280 = vmatpush.msra.mxu0 %v215_v39  ;;  %300 = vmatpush.msra.mxu1 %v216_v40  ;;  %v160_v6 = vsel %vm159_vm10, %v1216_v60, %v1217_v59 }
  0xb3   :  { %v202_v44 = vpop.permute.xlu1 %201  ;;  %v1195_v45 = vpop.permute.xlu0 %1194 }
  0xb4   :  { %v1197_v46 = vunpack.i.h.bf16 %v1195_v45  ;;  %v1196_v47 = vunpack.i.l.bf16 %v1195_v45  ;;  %v147_v3 = vpop.permute.xlu2 %146 }
  0xb6   :  { %v204_v48 = vsel %vm203_vm6, %v1196_v47, %v1197_v46  ;;  %v205_v49 = vsel %vm203_vm6, %v1197_v46, %v202_v44 }
  0xb7   :  { %281 = vmatpush.msra.mxu0 %v204_v48  ;;  %301 = vmatpush.msra.mxu1 %v205_v49 }
  0xb9   :  { %282 = vmatpush.msra.mxu0 %v193_v50 }
  0xbb   :  { %v1205_v52 = vpop.permute.xlu1 %1204  ;;  %v191_v53 = vpop.permute.xlu0 %190 }
  0xbc   :  { %v1207_v54 = vunpack.i.h.bf16 %v1205_v52  ;;  %v1206_v55 = vunpack.i.l.bf16 %v1205_v52  ;;  %v194_v56 = vsel %vm192_vm7, %v1202_v42, %v191_v53  ;;  %v1230_v14 = vpop.permute.xlu2 %1229 }
  0xbd   :  { %302 = vmatpush.msra.mxu1 %v194_v56  ;;  %v1232_v15 = vunpack.i.h.bf16 %v1230_v14  ;;  %v1231_v16 = vunpack.i.l.bf16 %v1230_v14  ;;  %v336_v56 = vld [vmem:[%s1793_s25] sm:$0xff] }
  0xbe   :  { %v182_v57 = vsel %vm181_vm8, %v1206_v55, %v1207_v54  ;;  %v183_v58 = vsel %vm181_vm8, %v1207_v54, %v180_v41  ;;  %v421_v14 = vld [vmem:[#allocation2 + $0xc0] sm:$0xff] }
  0xbf   :  { %283 = vmatpush.msra.mxu0 %v182_v57  ;;  %303 = vmatpush.msra.mxu1 %v183_v58  ;;  %v127_v23 = vsel %vm126_vm13, %v1231_v16, %v1232_v15  ;;  %v419_v16 = vld [vmem:[#allocation2 + $0xb0] sm:$0xff] }
  0xc3   :  { %v169_v61 = vpop.permute.xlu1 %168  ;;  %v1210_v62 = vpop.permute.xlu0 %1209 }
  0xc4   :  { %v1212_v63 = vunpack.i.h.bf16 %v1210_v62  ;;  %v1211_v2 = vunpack.i.l.bf16 %v1210_v62  ;;  %v114_v24 = vpop.permute.xlu2 %113 }
  0xc6   :  { %v171_v4 = vsel %vm170_vm9, %v1211_v2, %v1212_v63  ;;  %v172_v5 = vsel %vm170_vm9, %v1212_v63, %v169_v61  ;;  %v349_v61 = vld [vmem:[%s1794_s30] sm:$0xff]  ;;  %v427_v2 = vld [vmem:[#allocation2 + $0xf0] sm:$0xff] }
  0xc7   :  { %284 = vmatpush.msra.mxu0 %v171_v4  ;;  %304 = vmatpush.msra.mxu1 %v172_v5 }
  0xc8   :  { %471 = vmatpush.msra.mxu2 %v427_v2  ;;  %v430_v2 = vld [vmem:[#allocation2 + $0x108] sm:$0xff] }
  0xc9   :  { %285 = vmatpush.msra.mxu0 %v160_v6 }
  0xcb   :  { %v1220_v7 = vpop.permute.xlu1 %1219  ;;  %v158_v8 = vpop.permute.xlu0 %157 }
  0xcc   :  { %v1222_v9 = vunpack.i.h.bf16 %v1220_v7  ;;  %v1221_v10 = vunpack.i.l.bf16 %v1220_v7  ;;  %v161_v11 = vsel %vm159_vm10, %v1217_v59, %v158_v8  ;;  %v423_v7 = vld [vmem:[#allocation2 + $0xd0] sm:$0xff] }
  0xcd   :  { %305 = vmatpush.msra.mxu1 %v161_v11  ;;  %v428_v11 = vld [vmem:[#allocation2 + $0xf8] sm:$0xff] }
  0xce   :  { %v149_v12 = vsel %vm148_vm11, %v1221_v10, %v1222_v9  ;;  %v150_v13 = vsel %vm148_vm11, %v1222_v9, %v147_v3  ;;  %v425_v3 = vld [vmem:[#allocation2 + $0xe0] sm:$0xff]  ;;  %v460_v10 = vld [vmem:[#allocation2 + $0x1f8] sm:$0x1f] }
  0xcf   :  { %286 = vmatpush.msra.mxu0 %v149_v12  ;;  %306 = vmatpush.msra.mxu1 %v150_v13 }
  0xd0   :  { %472 = vmatpush.msra.mxu2 %v425_v3  ;;  %v437_v3 = vld [vmem:[#allocation2 + $0x140] sm:$0xff] }
  0xd2   :  { %473 = vmatpush.msra.mxu2 %v423_v7 }
  0xd3   :  { %v136_v17 = vpop.permute.xlu1 %135  ;;  %v1225_v18 = vpop.permute.xlu0 %1224 }
  0xd4   :  { %v1227_v19 = vunpack.i.h.bf16 %v1225_v18  ;;  %v1226_v20 = vunpack.i.l.bf16 %v1225_v18  ;;  %474 = vmatpush.msra.mxu2 %v421_v14  ;;  %v415_v18 = vld [vmem:[#allocation2 + $0x90] sm:$0xff] }
  0xd6   :  { %v138_v21 = vsel %vm137_vm12, %v1226_v20, %v1227_v19  ;;  %v139_v22 = vsel %vm137_vm12, %v1227_v19, %v136_v17  ;;  %v417_v17 = vld [vmem:[#allocation2 + $0xa0] sm:$0xff]  ;;  %475 = vmatpush.msra.mxu2 %v419_v16  ;;  %v411_v20 = vld [vmem:[#allocation2 + $0x70] sm:$0xff] }
  0xd7   :  { %287 = vmatpush.msra.mxu0 %v138_v21  ;;  %307 = vmatpush.msra.mxu1 %v139_v22  ;;  %v413_v19 = vld [vmem:[#allocation2 + $0x80] sm:$0xff]  ;;  %v407_v22 = vld [vmem:[#allocation2 + $0x50] sm:$0xff] }
  0xd8   :  { %476 = vmatpush.msra.mxu2 %v417_v17  ;;  %v409_v21 = vld [vmem:[#allocation2 + $0x60] sm:$0xff] }
  0xd9   :  { %288 = vmatpush.msra.mxu0 %v127_v23  ;;  %v405_v23 = vld [vmem:[#allocation2 + $0x40] sm:$0xff] }
  0xda   :  { %477 = vmatpush.msra.mxu2 %v415_v18 }
  0xdb   :  { %v1235_v25 = vpop.permute.xlu1 %1234  ;;  %v125_v26 = vpop.permute.xlu0 %124 }
  0xdc   :  { %v1237_v27 = vunpack.i.h.bf16 %v1235_v25  ;;  %v1236_v28 = vunpack.i.l.bf16 %v1235_v25  ;;  %v128_v29 = vsel %vm126_vm13, %v1232_v15, %v125_v26  ;;  %v458_v15 = vld [vmem:[#allocation2 + $0x1e8] sm:$0xff]  ;;  %478 = vmatpush.msra.mxu2 %v413_v19  ;;  %v401_v26 = vld [vmem:[#allocation2 + $0x20] sm:$0xff] }
  0xdd   :  { %308 = vmatpush.msra.mxu1 %v128_v29  ;;  %v426_v25 = vld [vmem:[#allocation2 + $0xe8] sm:$0xff]  ;;  %v399_v29 = vld [vmem:[#allocation2 + $0x10] sm:$0xff] }
  0xde   :  { %v116_v30 = vsel %vm115_vm14, %v1236_v28, %v1237_v27  ;;  %v117_v31 = vsel %vm115_vm14, %v1237_v27, %v114_v24  ;;  %479 = vmatpush.msra.mxu2 %v411_v20  ;;  %v403_v24 = vld [vmem:[#allocation2 + $0x30] sm:$0xff]  ;;  %v456_v27 = vld [vmem:[#allocation2 + $0x1d8] sm:$0xff] }
  0xdf   :  { %289 = vmatpush.msra.mxu0 %v116_v30  ;;  %309 = vmatpush.msra.mxu1 %v117_v31  ;;  %v424_v28 = vld [vmem:[#allocation2 + $0xd8] sm:$0xff]  ;;  %v454_v30 = vld [vmem:[#allocation2 + $0x1c8] sm:$0xff] }
  0xe0   :  { %480 = vmatpush.msra.mxu2 %v409_v21  ;;  %v422_v31 = vld [vmem:[#allocation2 + $0xc8] sm:$0xff] }
  0xe1   :  { %290 = vmatpush.msra.mxu0 %v1495_v0  ;;  %310 = vmatpush.msra.mxu1 %v1500_v1  ;;  %v1370_v0 = vmov 0  }
  0xe2   :  { %291 = vmatmul.f32.vlgmr.msra.gmra.mxu0 %v274_v32  ;;  %311 = vmatmul.f32.vlgmr.msra.gmra.mxu1 %v274_v32  ;;  %v397_v32 = vld [vmem:[#allocation2] sm:$0xff] }
  0xe3   :  { %1238 = vset.pattern.permute.xlu2 %v1370_v0  ;;  %1264 = vset.pattern.permute.xlu1 %v1370_v0 }
  0xe4   :  { %1290 = vset.pattern.permute.xlu0 %v1370_v0  ;;  %1117 = vmatpush.msk.msrb.mxu1 %vm464_vm2, %v460_v10  ;;  %v414_v0 = vld [vmem:[#allocation2 + $0x88] sm:$0xff] }
  0xe5   :  { %511 = vmatpush.msrb.mxu0 %v428_v11  ;;  %481 = vmatpush.msra.mxu2 %v407_v22 }
  0xe6   :  { %532 = vmatpush.msrb.mxu1 %v458_v15 }
  0xe7   :  { %482 = vmatpush.msra.mxu2 %v405_v23  ;;  %512 = vmatpush.msrb.mxu0 %v426_v25 }
  0xe8   :  { %533 = vmatpush.msrb.mxu1 %v456_v27 }
  0xe9   :  { %483 = vmatpush.msra.mxu2 %v403_v24  ;;  %513 = vmatpush.msrb.mxu0 %v424_v28 }
  0xea   :  { %534 = vmatpush.msrb.mxu1 %v454_v30 }
  0xeb   :  { %484 = vmatpush.msra.mxu2 %v401_v26  ;;  %514 = vmatpush.msrb.mxu0 %v422_v31 }
  0xec   :  { %535 = vmatpush.msrb.mxu1 %v452_v33 }
  0xed   :  { %485 = vmatpush.msra.mxu2 %v399_v29 }
  0xef   :  { %486 = vmatpush.msra.mxu2 %v397_v32 }
 0x15f   :  { %v292_v36 = vpop.f32.mrf.mxu0  ;;  %v312_v37 = vpop.f32.mrf.mxu1 }
 0x160   :  { %v321_v38 = vmul.f32 %v317_v34, %v292_v36  ;;  %v322_v39 = vmul.f32 %v318_v35, %v312_v37  ;;  %v459_v34 = vld [vmem:[#allocation2 + $0x1f0] sm:$0x1f]  ;;  %v420_v35 = vld [vmem:[#allocation2 + $0xb8] sm:$0xff] }
 0x161   :  { %1115 = vmatpush.msk.msrb.mxu2 %vm464_vm2, %v459_v34  ;;  %515 = vmatpush.msrb.mxu0 %v420_v35 }
 0x162   :  { %v323_v40 = vadd.f32 %v322_v39, %v321_v38  ;;  %v326_v41 = vmul.f32 %v321_v38, %v292_v36  ;;  %v327_v42 = vmul.f32 %v322_v39, %v312_v37  ;;  %v418_v38 = vld [vmem:[#allocation2 + $0xa8] sm:$0xff]  ;;  %v448_v39 = vld [vmem:[#allocation2 + $0x198] sm:$0xff] }
 0x163   :  { %516 = vmatpush.msrb.mxu0 %v418_v38 }
 0x164   :  { %324 = vadd.xlane.f32.xlu0 %v323_v40  ;;  %v328_v43 = vadd.f32 %v327_v42, %v326_v41  ;;  %v455_v40 = vld [vmem:[#allocation2 + $0x1d0] sm:$0xff]  ;;  %v416_v41 = vld [vmem:[#allocation2 + $0x98] sm:$0xff]  ;;  %v446_v42 = vld [vmem:[#allocation2 + $0x188] sm:$0xff] }
 0x165   :  { %517 = vmatpush.msrb.mxu0 %v416_v41 }
 0x166   :  { %329 = vadd.xlane.f32.xlu1 %v328_v43  ;;  %v453_v43 = vld [vmem:[#allocation2 + $0x1c0] sm:$0xff] }
 0x167   :  { %518 = vmatpush.msrb.mxu0 %v414_v0 }
 0x1d7   :  { %v325_v1 = vpop.xlane.xlu0 %324 }
 0x1d8   :  { %v331_v44 = vmul.f32 0.0044247787, %v325_v1  ;;  %v444_v1 = vld [vmem:[#allocation2 + $0x178] sm:$0xff] }
 0x1d9   :  { %v330_v45 = vpop.xlane.xlu1 %329 }
 0x1da   :  { %v333_v46 = vmul.f32 %v331_v44, %v331_v44  ;;  %v332_v47 = vmul.f32 0.0044247787, %v330_v45  ;;  %v412_v45 = vld [vmem:[#allocation2 + $0x78] sm:$0xff] }
 0x1db   :  { %519 = vmatpush.msrb.mxu0 %v412_v45 }
 0x1dc   :  { %v334_v48 = vsub.f32 %v332_v47, %v333_v46  ;;  %v442_v46 = vld [vmem:[#allocation2 + $0x168] sm:$0xff]  ;;  %v449_v47 = vld [vmem:[#allocation2 + $0x1a0] sm:$0xff] }
 0x1de   :  { %v335_v49 = vmax.f32 %v334_v48, 0.0  ;;  %v410_v48 = vld [vmem:[#allocation2 + $0x68] sm:$0xff] }
 0x1df   :  { %520 = vmatpush.msrb.mxu0 %v410_v48 }
 0x1e0   :  { %v337_v50 = vadd.f32 1e-05, %v335_v49  ;;  %v440_v49 = vld [vmem:[#allocation2 + $0x158] sm:$0xff] }
 0x1e2   :  { %1293 = vrsqrt.f32 %v337_v50  ;;  %vm344_vm0 = vweird.f32 %v337_v50 }
 0x1e8   :  { %v1294_v51 = vpop.eup %1293 }
 0x1e9   :  { %v339_v52 = vmul.f32 %v1294_v51, %v337_v50  ;;  %vm345_vm15 = vweird.f32 %v1294_v51  ;;  %v447_v50 = vld [vmem:[#allocation2 + $0x190] sm:$0xff] }
 0x1ea   :  { %vm346_vm1 = vmor %vm344_vm0, %vm345_vm15 }
 0x1eb   :  { %v340_v53 = vmul.f32 %v1294_v51, %v339_v52  ;;  %v438_v52 = vld [vmem:[#allocation2 + $0x148] sm:$0xff] }
 0x1ed   :  { %v341_v54 = vmul.f32 0.5, %v340_v53  ;;  %v445_v53 = vld [vmem:[#allocation2 + $0x180] sm:$0xff] }
 0x1ef   :  { %v342_v55 = vsub.f32 1.5, %v341_v54  ;;  %v406_v54 = vld [vmem:[#allocation2 + $0x48] sm:$0xff] }
 0x1f1   :  { %v343_v57 = vmul.f32 %v1294_v51, %v342_v55  ;;  %v436_v55 = vld [vmem:[#allocation2 + $0x138] sm:$0xff] }
 0x1f3   :  { %v347_v58 = vsel %vm346_vm1, %v1294_v51, %v343_v57  ;;  %v408_v51 = vld [vmem:[#allocation2 + $0x58] sm:$0xff] }
 0x1f4   :  { %v348_v59 = vmul.f32 %v347_v58, %v336_v56  ;;  %521 = vmatpush.msrb.mxu0 %v408_v51  ;;  %v443_v56 = vld [vmem:[#allocation2 + $0x170] sm:$0xff]  ;;  %v404_v57 = vld [vmem:[#allocation2 + $0x38] sm:$0xff]  ;;  %v434_v58 = vld [vmem:[#allocation2 + $0x128] sm:$0xff] }
 0x1f6   :  { %354 = vperm.xlu2 %1238, %v348_v59   ;;  %v350_v60 = vmul.f32 %v348_v59, %v331_v44  ;;  %v451_v44 = vld [vmem:[#allocation2 + $0x1b0] sm:$0xff]  ;;  %522 = vmatpush.msrb.mxu0 %v406_v54  ;;  %v441_v59 = vld [vmem:[#allocation2 + $0x160] sm:$0xff] }
 0x1f8   :  { %v351_v62 = vsub.f32 %v349_v61, %v350_v60  ;;  %523 = vmatpush.msrb.mxu0 %v404_v57  ;;  %v402_v60 = vld [vmem:[#allocation2 + $0x28] sm:$0xff]  ;;  %v432_v61 = vld [vmem:[#allocation2 + $0x118] sm:$0xff] }
 0x1fa   :  { %524 = vmatpush.msrb.mxu0 %v402_v60 }
 0x1fe   :  { %361 = vperm.xlu2 %1238, %v351_v62   ;;  %v439_v62 = vld [vmem:[#allocation2 + $0x150] sm:$0xff] }
 0x250   :  { %v355_v63 = vpop.permute.xlu2 %354 }
 0x251   :  { %v357_v4 = vmul.f32 %v355_v63, %v292_v36  ;;  %v358_v5 = vmul.f32 %v355_v63, %v312_v37  ;;  %v450_v36 = vld [vmem:[#allocation2 + $0x1a8] sm:$0xff]  ;;  %v457_v37 = vld [vmem:[#allocation2 + $0x1e0] sm:$0xff]  ;;  %v400_v63 = vld [vmem:[#allocation2 + $0x18] sm:$0xff] }
 0x252   :  { %536 = vmatpush.msrb.mxu1 %v450_v36  ;;  %492 = vmatpush.msrb.mxu2 %v457_v37 }
 0x253   :  { %525 = vmatpush.msrb.mxu0 %v400_v63 }
 0x254   :  { %537 = vmatpush.msrb.mxu1 %v448_v39  ;;  %493 = vmatpush.msrb.mxu2 %v455_v40 }
 0x256   :  { %538 = vmatpush.msrb.mxu1 %v446_v42  ;;  %494 = vmatpush.msrb.mxu2 %v453_v43 }
 0x258   :  { %v362_v6 = vpop.permute.xlu2 %361  ;;  %539 = vmatpush.msrb.mxu1 %v444_v1  ;;  %495 = vmatpush.msrb.mxu2 %v451_v44 }
 0x259   :  { %v364_v8 = vadd.f32 %v362_v6, %v357_v4  ;;  %v365_v9 = vadd.f32 %v362_v6, %v358_v5  ;;  %v398_v4 = vld [vmem:[#allocation2 + $0x8] sm:$0xff]  ;;  %v435_v5 = vld [vmem:[#allocation2 + $0x130] sm:$0xff]  ;;  %v433_v6 = vld [vmem:[#allocation2 + $0x120] sm:$0xff] }
 0x25a   :  { %540 = vmatpush.msrb.mxu1 %v442_v46  ;;  %496 = vmatpush.msrb.mxu2 %v449_v47 }
 0x25b   :  { %v1543_v12 = vmax.f32 %v364_v8, 0.0  ;;  %v1545_v13 = vmax.f32 %v365_v9, 0.0  ;;  %526 = vmatpush.msrb.mxu0 %v398_v4  ;;  %v431_v8 = vld [vmem:[#allocation2 + $0x110] sm:$0xff]  ;;  %v429_v9 = vld [vmem:[#allocation2 + $0x100] sm:$0xff] }
 0x25c   :  { %541 = vmatpush.msrb.mxu1 %v440_v49  ;;  %497 = vmatpush.msrb.mxu2 %v447_v50  ;;  %v583_v49 = vld [vmem:[%s1795_s23] sm:$0xff] }
 0x25d   :  { %390 = vrot.lane.b32.xlu1 %v1545_v13, %s1367_s28  ;;  %388 = vrot.lane.b32.xlu0 %v1543_v12, %s1367_s28  ;;  %v1291_v50 = vld [vmem:[%s1767_s9] ss:$0 sm:$0xff] }
 0x25e   :  { %370 = vrot.lane.b32.xlu2 %v1543_v12, %s1369_s10  ;;  %542 = vmatpush.msrb.mxu1 %v438_v52 }
 0x25f   :  { %498 = vmatpush.msrb.mxu2 %v445_v53 }
 0x260   :  { %543 = vmatpush.msrb.mxu1 %v436_v55 }
 0x261   :  { %499 = vmatpush.msrb.mxu2 %v443_v56 }
 0x262   :  { %544 = vmatpush.msrb.mxu1 %v434_v58 }
 0x263   :  { %500 = vmatpush.msrb.mxu2 %v441_v59 }
 0x264   :  { %545 = vmatpush.msrb.mxu1 %v432_v61 }
 0x265   :  { %501 = vmatpush.msrb.mxu2 %v439_v62 }
 0x266   :  { %372 = vrot.lane.b32.xlu2 %v1545_v13, %s1369_s10  ;;  %546 = vmatpush.msrb.mxu1 %v430_v2 }
 0x267   :  { %502 = vmatpush.msrb.mxu2 %v437_v3 }
 0x269   :  { %503 = vmatpush.msrb.mxu2 %v435_v5  ;;  %v623_v5 = vld [vmem:[%s1765_s7] sm:$0xff] }
 0x26b   :  { %504 = vmatpush.msrb.mxu2 %v433_v6 }
 0x26d   :  { %505 = vmatpush.msrb.mxu2 %v431_v8 }
 0x26e   :  { %379 = vrot.lane.b32.xlu2 %v1543_v12, %s1368_s29 }
 0x26f   :  { %506 = vmatpush.msrb.mxu2 %v429_v9 }
 0x276   :  { %381 = vrot.lane.b32.xlu2 %v1545_v13, %s1368_s29 }
 0x2b8   :  { %v371_v7 = vpop.permute.xlu2 %370 }
 0x2c0   :  { %v373_v10 = vpop.permute.xlu2 %372 }
 0x2c1   :  { %v374_v14 = vsel %vm115_vm14, %v371_v7, %v373_v10  ;;  %v378_v15 = vmax.f32 %v1545_v13, %v373_v10  ;;  %v636_v10 = vld [vmem:[%s1766_s8] sm:$0xff] }
 0x2c2   :  { %v377_v17 = vmax.f32 %v1543_v12, %v374_v14  ;;  %v695_v14 = vld [vmem:[#allocation4 + $0xf0] sm:$0x1f] }
 0x2c3   :  { %1120 = vmatpush.msk.msra.mxu3 %vm464_vm2, %v695_v14 }
 0x2c8   :  { %v380_v11 = vpop.permute.xlu2 %379 }
 0x2cf   :  { %v391_v16 = vpop.permute.xlu1 %390  ;;  %v389_v18 = vpop.permute.xlu0 %388 }
 0x2d0   :  { %v382_v19 = vpop.permute.xlu2 %381  ;;  %v392_v23 = vsel %vm137_vm12, %v389_v18, %v391_v16  ;;  %v691_v18 = vld [vmem:[#allocation4 + $0xd0] sm:$0xff] }
 0x2d1   :  { %v383_v20 = vsel %vm126_vm13, %v380_v11, %v382_v19  ;;  %v387_v21 = vmax.f32 %v378_v15, %v382_v19  ;;  %v696_v15 = vld [vmem:[#allocation4 + $0xf8] sm:$0x1f] }
 0x2d2   :  { %v386_v22 = vmax.f32 %v377_v17, %v383_v20  ;;  %v694_v17 = vld [vmem:[#allocation4 + $0xe8] sm:$0xff]  ;;  %v692_v19 = vld [vmem:[#allocation4 + $0xd8] sm:$0xff] }
 0x2d3   :  { %v396_v24 = vmax.f32 %v387_v21, %v391_v16  ;;  %v693_v16 = vld [vmem:[#allocation4 + $0xe0] sm:$0xff] }
 0x2d4   :  { %v395_v25 = vmax.f32 %v386_v22, %v392_v23  ;;  %707 = vmatpush.msra.mxu3 %v693_v16  ;;  %v689_v21 = vld [vmem:[#allocation4 + $0xc0] sm:$0xff]  ;;  %v690_v22 = vld [vmem:[#allocation4 + $0xc8] sm:$0xff]  ;;  %v687_v23 = vld [vmem:[#allocation4 + $0xb0] sm:$0xff] }
 0x2d5   :  { %1118 = vmatmul.msk.f32.vlgmr.msrb.gmra.mxu1 %vm137_vm12, %v396_v24  ;;  %v778_v16 = vld [vmem:[%s1769_s11] sm:$0xff] }
 0x2d6   :  { %487 = vmatmul.f32.vlgmr.msra.gmra.mxu2 %v395_v25  ;;  %527 = vmatmul.f32.vlgmr.msrb.gmra.mxu0 %v395_v25  ;;  %v685_v25 = vld [vmem:[#allocation4 + $0xa0] sm:$0xff] }
 0x2d7   :  { %708 = vmatpush.msra.mxu3 %v691_v18 }
 0x2d9   :  { %709 = vmatpush.msra.mxu3 %v689_v21  ;;  %v1009_v21 = vld [vmem:[%s1777_s19 + $0x10] sm:$0xff] }
 0x2db   :  { %710 = vmatpush.msra.mxu3 %v687_v23 }
 0x2dd   :  { %711 = vmatpush.msra.mxu3 %v685_v25 }
 0x2de   :  { %1116 = vmatmul.msk.f32.vlgmr.msrb.gmra.mxu2 %vm137_vm12, %v396_v24  ;;  %v688_v24 = vld [vmem:[#allocation4 + $0xb8] sm:$0xff] }
 0x352   :  { %v548_v26 = vpop.f32.mrf.mxu1 }
 0x353   :  { %v528_v27 = vpop.f32.mrf.mxu0 }
 0x354   :  { %v549_v28 = vadd.f32 %v548_v26, %v528_v27  ;;  %v683_v27 = vld [vmem:[#allocation4 + $0x90] sm:$0xff] }
 0x355   :  { %712 = vmatpush.msra.mxu3 %v683_v27 }
 0x359   :  { %v488_v13 = vpop.f32.mrf.mxu2 }
 0x361   :  { %v508_v12 = vpop.f32.mrf.mxu2 }
 0x362   :  { %v509_v29 = vadd.f32 %v508_v12, %v488_v13  ;;  %v686_v13 = vld [vmem:[#allocation4 + $0xa8] sm:$0xff]  ;;  %v684_v12 = vld [vmem:[#allocation4 + $0x98] sm:$0xff] }
 0x364   :  { %v1259_v30 = vpack.i.bf16 %v549_v28, %v509_v29 }
 0x366   :  { %1260 = vrot.lane.b32.xlu1 %v1259_v30, %s1369_s10  ;;  %1250 = vrot.lane.b32.xlu0 %v1259_v30, %s1367_s28 }
 0x367   :  { %1240 = vrot.lane.b32.xlu2 %v1259_v30, %s1365_s27 }
 0x36f   :  { %1245 = vrot.lane.b32.xlu2 %v1259_v30, %s1366_s3 }
 0x377   :  { %1255 = vrot.lane.b32.xlu2 %v1259_v30, %s1368_s29 }
 0x3c1   :  { %v1241_v31 = vpop.permute.xlu2 %1240 }
 0x3c2   :  { %v1243_v32 = vunpack.i.h.bf16 %v1241_v31  ;;  %v1242_v33 = vunpack.i.l.bf16 %v1241_v31  ;;  %v681_v31 = vld [vmem:[#allocation4 + $0x80] sm:$0xff] }
 0x3c3   :  { %713 = vmatpush.msra.mxu3 %v681_v31 }
 0x3c4   :  { %v581_v34 = vsel %vm159_vm10, %v1242_v33, %v1243_v32  ;;  %v682_v32 = vld [vmem:[#allocation4 + $0x88] sm:$0xff]  ;;  %v679_v33 = vld [vmem:[#allocation4 + $0x70] sm:$0xff] }
 0x3c5   :  { %598 = vmatpush.msra.mxu2 %v581_v34  ;;  %v680_v34 = vld [vmem:[#allocation4 + $0x78] sm:$0xff]  ;;  %714 = vmatpush.msra.mxu3 %v679_v33  ;;  %v817_v33 = vld [vmem:[%s1770_s12] sm:$0xff] }
 0x3c9   :  { %v1246_v35 = vpop.permute.xlu2 %1245 }
 0x3ca   :  { %v1248_v36 = vunpack.i.h.bf16 %v1246_v35  ;;  %v1247_v37 = vunpack.i.l.bf16 %v1246_v35  ;;  %v677_v35 = vld [vmem:[#allocation4 + $0x60] sm:$0xff] }
 0x3cb   :  { %715 = vmatpush.msra.mxu3 %v677_v35 }
 0x3cc   :  { %v575_v38 = vsel %vm148_vm11, %v1247_v37, %v1248_v36  ;;  %v678_v36 = vld [vmem:[#allocation4 + $0x68] sm:$0xff]  ;;  %v675_v37 = vld [vmem:[#allocation4 + $0x50] sm:$0xff] }
 0x3cd   :  { %599 = vmatpush.msra.mxu2 %v575_v38  ;;  %v676_v38 = vld [vmem:[#allocation4 + $0x58] sm:$0xff]  ;;  %716 = vmatpush.msra.mxu3 %v675_v37 }
 0x3d1   :  { %v1256_v39 = vpop.permute.xlu2 %1255 }
 0x3d2   :  { %v1258_v42 = vunpack.i.h.bf16 %v1256_v39  ;;  %v1257_v43 = vunpack.i.l.bf16 %v1256_v39  ;;  %v673_v39 = vld [vmem:[#allocation4 + $0x40] sm:$0xff] }
 0x3d3   :  { %717 = vmatpush.msra.mxu3 %v673_v39 }
 0x3d4   :  { %v563_v47 = vsel %vm126_vm13, %v1257_v43, %v1258_v42  ;;  %v672_v42 = vld [vmem:[#allocation4 + $0x38] sm:$0xff]  ;;  %v669_v43 = vld [vmem:[#allocation4 + $0x20] sm:$0xff] }
 0x3d8   :  { %v1261_v40 = vpop.permute.xlu1 %1260  ;;  %v1251_v41 = vpop.permute.xlu0 %1250 }
 0x3d9   :  { %v1253_v0 = vunpack.i.h.bf16 %v1251_v41  ;;  %v1252_v1 = vunpack.i.l.bf16 %v1251_v41  ;;  %v1263_v44 = vunpack.i.h.bf16 %v1261_v40  ;;  %v1262_v45 = vunpack.i.l.bf16 %v1261_v40  ;;  %v674_v40 = vld [vmem:[#allocation4 + $0x48] sm:$0xff]  ;;  %v671_v41 = vld [vmem:[#allocation4 + $0x30] sm:$0xff] }
 0x3da   :  { %718 = vmatpush.msra.mxu3 %v671_v41 }
 0x3db   :  { %v569_v46 = vsel %vm137_vm12, %v1252_v1, %v1253_v0  ;;  %v557_v48 = vsel %vm115_vm14, %v1262_v45, %v1263_v44  ;;  %v670_v0 = vld [vmem:[#allocation4 + $0x28] sm:$0xff]  ;;  %v667_v1 = vld [vmem:[#allocation4 + $0x10] sm:$0xff]  ;;  %v668_v44 = vld [vmem:[#allocation4 + $0x18] sm:$0xff] }
 0x3dc   :  { %600 = vmatpush.msra.mxu2 %v569_v46  ;;  %719 = vmatpush.msra.mxu3 %v669_v43  ;;  %v665_v45 = vld [vmem:[#allocation4] sm:$0xff]  ;;  %v666_v46 = vld [vmem:[#allocation4 + $0x8] sm:$0xff] }
 0x3de   :  { %601 = vmatpush.msra.mxu2 %v563_v47  ;;  %720 = vmatpush.msra.mxu3 %v667_v1  ;;  %v1008_v1 = vld [vmem:[%s1777_s19 + $0x8] sm:$0xff] }
 0x3e0   :  { %602 = vmatpush.msra.mxu2 %v557_v48  ;;  %721 = vmatpush.msra.mxu3 %v665_v45  ;;  %v1077_v45 = vld [vmem:[%s1779_s21] sm:$0x3] }
 0x3e2   :  { %603 = vmatpush.msra.mxu2 %v509_v29 }
 0x3e3   :  { %1119 = vmatmul.msk.f32.vlgmr.msra.gmra.mxu2 %vm584_vm3, %v583_v49 }
 0x3e4   :  { %1122 = vmatpush.msk.msrb.mxu2 %vm464_vm2, %v696_v15 }
 0x3e6   :  { %727 = vmatpush.msrb.mxu2 %v694_v17  ;;  %v1292_v17 = vld [vmem:[%s1772_s14] ss:$0 sm:$0xff] }
 0x3e8   :  { %728 = vmatpush.msrb.mxu2 %v692_v19 }
 0x3ea   :  { %729 = vmatpush.msrb.mxu2 %v690_v22 }
 0x3ec   :  { %730 = vmatpush.msrb.mxu2 %v688_v24 }
 0x3ee   :  { %731 = vmatpush.msrb.mxu2 %v686_v13 }
 0x3f0   :  { %732 = vmatpush.msrb.mxu2 %v684_v12 }
 0x3f2   :  { %733 = vmatpush.msrb.mxu2 %v682_v32 }
 0x3f4   :  { %734 = vmatpush.msrb.mxu2 %v680_v34 }
 0x3f6   :  { %735 = vmatpush.msrb.mxu2 %v678_v36 }
 0x3f8   :  { %736 = vmatpush.msrb.mxu2 %v676_v38  ;;  %v830_v38 = vld [vmem:[%s1771_s13] sm:$0xff] }
 0x3fa   :  { %737 = vmatpush.msrb.mxu2 %v674_v40 }
 0x3fc   :  { %738 = vmatpush.msrb.mxu2 %v672_v42 }
 0x3fe   :  { %739 = vmatpush.msrb.mxu2 %v670_v0 }
 0x400   :  { %740 = vmatpush.msrb.mxu2 %v668_v44  ;;  %v1007_v44 = vld [vmem:[%s1777_s19] sm:$0xff] }
 0x402   :  { %741 = vmatpush.msrb.mxu2 %v666_v46 }
 0x466   :  { %v605_v51 = vpop.f32.mrf.mxu2 }
 0x467   :  { %v612_v52 = vmul.f32 %v1291_v50, %v605_v51 }
 0x469   :  { %613 = vadd.xlane.f32.xlu0 %v612_v52  ;;  %v615_v53 = vmul.f32 %v612_v52, %v605_v51 }
 0x46b   :  { %616 = vadd.xlane.f32.xlu2 %v615_v53 }
 0x4dc   :  { %v614_v54 = vpop.xlane.xlu0 %613 }
 0x4dd   :  { %v618_v55 = vmul.f32 0.01, %v614_v54 }
 0x4de   :  { %v617_v56 = vpop.xlane.xlu2 %616 }
 0x4df   :  { %v620_v57 = vmul.f32 %v618_v55, %v618_v55  ;;  %v619_v58 = vmul.f32 0.01, %v617_v56 }
 0x4e1   :  { %v621_v59 = vsub.f32 %v619_v58, %v620_v57 }
 0x4e3   :  { %v622_v60 = vmax.f32 %v621_v59, 0.0 }
 0x4e5   :  { %v624_v61 = vadd.f32 1e-05, %v622_v60 }
 0x4e7   :  { %1295 = vrsqrt.f32 %v624_v61  ;;  %vm631_vm5 = vweird.f32 %v624_v61 }
 0x4ed   :  { %v1296_v62 = vpop.eup %1295 }
 0x4ee   :  { %v626_v63 = vmul.f32 %v1296_v62, %v624_v61  ;;  %vm632_vm4 = vweird.f32 %v1296_v62 }
 0x4ef   :  { %vm633_vm6 = vmor %vm631_vm5, %vm632_vm4 }
 0x4f0   :  { %v627_v2 = vmul.f32 %v1296_v62, %v626_v63 }
 0x4f2   :  { %v628_v3 = vmul.f32 0.5, %v627_v2 }
 0x4f4   :  { %v629_v4 = vsub.f32 1.5, %v628_v3 }
 0x4f6   :  { %v630_v6 = vmul.f32 %v1296_v62, %v629_v4 }
 0x4f8   :  { %v634_v7 = vsel %vm633_vm6, %v1296_v62, %v630_v6 }
 0x4f9   :  { %v635_v8 = vmul.f32 %v634_v7, %v623_v5 }
 0x4fb   :  { %641 = vperm.xlu1 %1264, %v635_v8   ;;  %v637_v9 = vmul.f32 %v635_v8, %v618_v55 }
 0x4fd   :  { %v638_v11 = vsub.f32 %v636_v10, %v637_v9 }
 0x503   :  { %647 = vperm.xlu1 %1264, %v638_v11  }
 0x56d   :  { %v642_v20 = vpop.permute.xlu1 %641 }
 0x56e   :  { %v644_v26 = vmul.f32 %v642_v20, %v605_v51 }
 0x575   :  { %v648_v28 = vpop.permute.xlu1 %647 }
 0x576   :  { %v650_v29 = vadd.f32 %v648_v28, %v644_v26 }
 0x578   :  { %v651_v30 = vmax.f32 %v650_v29, 0.0 }
 0x57a   :  { %653 = vrot.lane.b32.xlu1 %v651_v30, %s1369_s10 }
 0x582   :  { %657 = vrot.lane.b32.xlu1 %v651_v30, %s1368_s29 }
 0x58a   :  { %661 = vrot.lane.b32.xlu1 %v651_v30, %s1367_s28 }
 0x5ec   :  { %v654_v47 = vpop.permute.xlu1 %653 }
 0x5ed   :  { %v656_v49 = vmax.f32 %v651_v30, %v654_v47 }
 0x5f4   :  { %v658_v48 = vpop.permute.xlu1 %657 }
 0x5f5   :  { %v660_v50 = vmax.f32 %v656_v49, %v658_v48 }
 0x5fc   :  { %v662_v51 = vpop.permute.xlu1 %661 }
 0x5fd   :  { %v664_v52 = vmax.f32 %v660_v50, %v662_v51 }
 0x5ff   :  { %1121 = vmatmul.msk.f32.vlgmr.msra.gmra.mxu3 %vm137_vm12, %v664_v52  ;;  %1123 = vmatmul.msk.f32.vlgmr.msrb.gmra.mxu2 %vm137_vm12, %v664_v52  ;;  %v859_v52 = vld [vmem:[%s1773_s15] sm:$0xff] }
 0x682   :  { %v723_v53 = vpop.f32.mrf.mxu3  ;;  %v743_v54 = vpop.f32.mrf.mxu2 }
 0x683   :  { %v1275_v55 = vpack.i.bf16 %v743_v54, %v723_v53  ;;  %v946_v54 = vld [vmem:[%s1775_s17 + $0x78] sm:$0x1f] }
 0x684   :  { %1131 = vmatpush.msk.msrb.mxu3 %vm464_vm2, %v946_v54 }
 0x685   :  { %1276 = vrot.lane.b32.xlu1 %v1275_v55, %s1367_s28  ;;  %1271 = vrot.lane.b32.xlu2 %v1275_v55, %s1366_s3 }
 0x686   :  { %1266 = vrot.lane.b32.xlu0 %v1275_v55, %s1365_s27 }
 0x68d   :  { %1281 = vrot.lane.b32.xlu1 %v1275_v55, %s1368_s29 }
 0x695   :  { %1286 = vrot.lane.b32.xlu1 %v1275_v55, %s1369_s10  ;;  %v945_v55 = vld [vmem:[%s1775_s17 + $0x70] sm:$0xff] }
 0x696   :  { %969 = vmatpush.msrb.mxu3 %v945_v55  ;;  %v1076_v55 = vld [vmem:[%s1778_s20] sm:$0x3] }
 0x6df   :  { %v1272_v56 = vpop.permute.xlu2 %1271 }
 0x6e0   :  { %v1274_v59 = vunpack.i.h.bf16 %v1272_v56  ;;  %v1273_v60 = vunpack.i.l.bf16 %v1272_v56  ;;  %v944_v56 = vld [vmem:[%s1775_s17 + $0x68] sm:$0xff] }
 0x6e1   :  { %970 = vmatpush.msrb.mxu3 %v944_v56 }
 0x6e2   :  { %v770_v4 = vsel %vm148_vm11, %v1273_v60, %v1274_v59  ;;  %v942_v59 = vld [vmem:[%s1775_s17 + $0x58] sm:$0xff]  ;;  %v941_v60 = vld [vmem:[%s1775_s17 + $0x50] sm:$0xff]  ;;  %vm1083_vm11 = vcmask 261120  }
 0x6f7   :  { %v1277_v57 = vpop.permute.xlu1 %1276 }
 0x6f8   :  { %v1267_v58 = vpop.permute.xlu0 %1266  ;;  %v1279_v63 = vunpack.i.h.bf16 %v1277_v57  ;;  %v1278_v2 = vunpack.i.l.bf16 %v1277_v57  ;;  %v943_v57 = vld [vmem:[%s1775_s17 + $0x60] sm:$0xff] }
 0x6f9   :  { %v1269_v61 = vunpack.i.h.bf16 %v1267_v58  ;;  %v1268_v62 = vunpack.i.l.bf16 %v1267_v58  ;;  %v861_v58 = vld [vmem:[%s1773_s15 + $0x10] sm:$0xff]  ;;  %971 = vmatpush.msrb.mxu3 %v943_v57 }
 0x6fa   :  { %v764_v6 = vsel %vm137_vm12, %v1278_v2, %v1279_v63  ;;  %v862_v63 = vld [vmem:[%s1773_s15 + $0x18] sm:$0xff] }
 0x6fb   :  { %v776_v3 = vsel %vm159_vm10, %v1268_v62, %v1269_v61  ;;  %vm865_vm10 = vcmask 64512   ;;  %972 = vmatpush.msrb.mxu3 %v942_v59  ;;  %v940_v61 = vld [vmem:[%s1775_s17 + $0x48] sm:$0xff]  ;;  %v939_v62 = vld [vmem:[%s1775_s17 + $0x40] sm:$0xff]  ;;  %v938_v2 = vld [vmem:[%s1775_s17 + $0x38] sm:$0xff] }
 0x6fc   :  { %792 = vmatpush.msra.mxu0 %v776_v3  ;;  %v937_v3 = vld [vmem:[%s1775_s17 + $0x30] sm:$0xff] }
 0x6fd   :  { %973 = vmatpush.msrb.mxu3 %v941_v60 }
 0x6fe   :  { %793 = vmatpush.msra.mxu0 %v770_v4  ;;  %v936_v4 = vld [vmem:[%s1775_s17 + $0x28] sm:$0xff] }
 0x6ff   :  { %v1282_v5 = vpop.permute.xlu1 %1281  ;;  %974 = vmatpush.msrb.mxu3 %v940_v61 }
 0x700   :  { %v1284_v7 = vunpack.i.h.bf16 %v1282_v5  ;;  %v1283_v8 = vunpack.i.l.bf16 %v1282_v5  ;;  %794 = vmatpush.msra.mxu0 %v764_v6  ;;  %v935_v5 = vld [vmem:[%s1775_s17 + $0x20] sm:$0xff] }
 0x701   :  { %975 = vmatpush.msrb.mxu3 %v939_v62  ;;  %v863_v6 = vld [vmem:[%s1773_s15 + $0x20] sm:$0xff] }
 0x702   :  { %v758_v9 = vsel %vm126_vm13, %v1283_v8, %v1284_v7  ;;  %v934_v7 = vld [vmem:[%s1775_s17 + $0x18] sm:$0xff]  ;;  %v933_v8 = vld [vmem:[%s1775_s17 + $0x10] sm:$0xff] }
 0x703   :  { %795 = vmatpush.msra.mxu0 %v758_v9  ;;  %976 = vmatpush.msrb.mxu3 %v938_v2  ;;  %v864_v9 = vld [vmem:[%s1773_s15 + $0x28] sm:$0xff] }
 0x705   :  { %977 = vmatpush.msrb.mxu3 %v937_v3 }
 0x707   :  { %v1287_v10 = vpop.permute.xlu1 %1286  ;;  %978 = vmatpush.msrb.mxu3 %v936_v4 }
 0x708   :  { %v1289_v11 = vunpack.i.h.bf16 %v1287_v10  ;;  %v1288_v14 = vunpack.i.l.bf16 %v1287_v10  ;;  %v932_v10 = vld [vmem:[%s1775_s17 + $0x8] sm:$0xff] }
 0x709   :  { %979 = vmatpush.msrb.mxu3 %v935_v5 }
 0x70a   :  { %v752_v15 = vsel %vm115_vm14, %v1288_v14, %v1289_v11  ;;  %v931_v11 = vld [vmem:[%s1775_s17] sm:$0xff] }
 0x70b   :  { %796 = vmatpush.msra.mxu0 %v752_v15  ;;  %980 = vmatpush.msrb.mxu3 %v934_v7  ;;  %v919_v14 = vld [vmem:[%s1774_s16] sm:$0xff] }
 0x70d   :  { %797 = vmatpush.msra.mxu0 %v723_v53  ;;  %v860_v53 = vld [vmem:[%s1773_s15 + $0x8] sm:$0xff]  ;;  %981 = vmatpush.msrb.mxu3 %v933_v8 }
 0x70e   :  { %1124 = vmatmul.msk.f32.vlgmr.msra.gmra.mxu0 %vm584_vm3, %v778_v16 }
 0x70f   :  { %982 = vmatpush.msrb.mxu3 %v932_v10 }
 0x711   :  { %983 = vmatpush.msrb.mxu3 %v931_v11 }
 0x78b   :  { %v799_v18 = vpop.f32.mrf.mxu0 }
 0x78c   :  { %v806_v19 = vmul.f32 %v1292_v17, %v799_v18  ;;  %v920_v17 = vld [vmem:[%s1774_s16 + $0x8] sm:$0xff] }
 0x78e   :  { %807 = vadd.xlane.f32.xlu0 %v806_v19  ;;  %v809_v20 = vmul.f32 %v806_v19, %v799_v18 }
 0x790   :  { %810 = vadd.xlane.f32.xlu2 %v809_v20  ;;  %v921_v20 = vld [vmem:[%s1774_s16 + $0x10] sm:$0xff] }
 0x7a8   :  { %1023 = vperm.xlu2 %1238, %v1009_v21  }
 0x801   :  { %v808_v22 = vpop.xlane.xlu0 %807 }
 0x802   :  { %v812_v23 = vmul.f32 0.02631579, %v808_v22 }
 0x803   :  { %v811_v24 = vpop.xlane.xlu2 %810 }
 0x804   :  { %v814_v25 = vmul.f32 %v812_v23, %v812_v23  ;;  %v813_v13 = vmul.f32 0.02631579, %v811_v24 }
 0x806   :  { %v815_v26 = vsub.f32 %v813_v13, %v814_v25  ;;  %v923_v13 = vld [vmem:[%s1774_s16 + $0x20] sm:$0xff] }
 0x808   :  { %v816_v27 = vmax.f32 %v815_v26, 0.0 }
 0x80a   :  { %v818_v12 = vadd.f32 1e-05, %v816_v27 }
 0x80c   :  { %1297 = vrsqrt.f32 %v818_v12  ;;  %vm825_vm8 = vweird.f32 %v818_v12 }
 0x812   :  { %v1298_v28 = vpop.eup %1297 }
 0x813   :  { %v820_v29 = vmul.f32 %v1298_v28, %v818_v12  ;;  %vm826_vm7 = vweird.f32 %v1298_v28  ;;  %v924_v12 = vld [vmem:[%s1774_s16 + $0x28] sm:$0xff] }
 0x814   :  { %vm827_vm9 = vmor %vm825_vm8, %vm826_vm7 }
 0x815   :  { %v821_v30 = vmul.f32 %v1298_v28, %v820_v29 }
 0x817   :  { %v822_v31 = vmul.f32 0.5, %v821_v30 }
 0x819   :  { %v823_v32 = vsub.f32 1.5, %v822_v31 }
 0x81b   :  { %v824_v34 = vmul.f32 %v1298_v28, %v823_v32 }
 0x81d   :  { %v828_v35 = vsel %vm827_vm9, %v1298_v28, %v824_v34 }
 0x81e   :  { %v829_v36 = vmul.f32 %v828_v35, %v817_v33 }
 0x820   :  { %835 = vperm.xlu1 %1264, %v829_v36   ;;  %v831_v37 = vmul.f32 %v829_v36, %v812_v23  ;;  %v922_v23 = vld [vmem:[%s1774_s16 + $0x18] sm:$0xff] }
 0x821   :  { %v1010_v36 = vld [vmem:[%s1777_s19 + $0x18] sm:$0xff] }
 0x822   :  { %v832_v39 = vsub.f32 %v830_v38, %v831_v37  ;;  %1028 = vperm.xlu0 %1290, %v1010_v36   ;;  %v1003_v37 = vld [vmem:[%s1776_s18] sm:$0xff]  ;;  %v1004_v38 = vld [vmem:[%s1776_s18 + $0x8] sm:$0xff] }
 0x828   :  { %841 = vperm.xlu1 %1264, %v832_v39   ;;  %v1005_v39 = vld [vmem:[%s1776_s18 + $0x10] sm:$0xff] }
 0x892   :  { %v836_v40 = vpop.permute.xlu1 %835 }
 0x893   :  { %v838_v41 = vmul.f32 %v836_v40, %v799_v18  ;;  %v1006_v40 = vld [vmem:[%s1776_s18 + $0x18] sm:$0xff] }
 0x89a   :  { %v842_v42 = vpop.permute.xlu1 %841 }
 0x89b   :  { %v844_v43 = vadd.f32 %v842_v42, %v838_v41 }
 0x89d   :  { %v845_v0 = vmax.f32 %v844_v43, 0.0 }
 0x89f   :  { %847 = vrot.lane.b32.xlu1 %v845_v0, %s1369_s10 }
 0x8a7   :  { %851 = vrot.lane.b32.xlu1 %v845_v0, %s1368_s29 }
 0x8af   :  { %855 = vrot.lane.b32.xlu1 %v845_v0, %s1367_s28 }
 0x8b7   :  { %1018 = vperm.xlu1 %1264, %v1008_v1   ;;  %v1029_v1 = vpop.permute.xlu0 %1028 }
 0x8bf   :  { %1013 = vperm.xlu1 %1264, %v1007_v44   ;;  %v1024_v44 = vpop.permute.xlu2 %1023 }
 0x8c7   :  { %1080 = vperm.xlu1 %1264, %v1077_v45  }
 0x911   :  { %v848_v46 = vpop.permute.xlu1 %847 }
 0x912   :  { %v850_v48 = vmax.f32 %v845_v0, %v848_v46 }
 0x919   :  { %v852_v47 = vpop.permute.xlu1 %851 }
 0x91a   :  { %v854_v49 = vmax.f32 %v850_v48, %v852_v47 }
 0x921   :  { %v856_v50 = vpop.permute.xlu1 %855 }
 0x922   :  { %v858_v51 = vmax.f32 %v854_v49, %v856_v50 }
 0x924   :  { %899 = vmatpush.msra.mxu1 %v858_v51 }
 0x925   :  { %1125 = vmatmul.msk.f32.vlgmr.msra.gmra.mxu1 %vm865_vm10, %v859_v52 }
 0x929   :  { %v1019_v0 = vpop.permute.xlu1 %1018 }
 0x92d   :  { %1126 = vmatmul.msk.f32.gmra.mxu1 %vm865_vm10, %v860_v53 }
 0x931   :  { %v1014_v50 = vpop.permute.xlu1 %1013 }
 0x935   :  { %1127 = vmatmul.msk.f32.gmra.mxu1 %vm865_vm10, %v861_v58 }
 0x939   :  { %v1081_v56 = vpop.permute.xlu1 %1080 }
 0x93d   :  { %1128 = vmatmul.msk.f32.gmra.mxu1 %vm865_vm10, %v862_v63 }
 0x945   :  { %1129 = vmatmul.msk.f32.gmra.mxu1 %vm865_vm10, %v863_v6 }
 0x94d   :  { %1130 = vmatmul.msk.f32.gmra.mxu1 %vm865_vm10, %v864_v9 }
 0x9a2   :  { %v901_v15 = vpop.f32.mrf.mxu1 }
 0x9a3   :  { %v925_v16 = vmul.f32 %v919_v14, %v901_v15 }
 0x9a5   :  { %1132 = vmatmul.msk.f32.vlgmr.msrb.gmra.mxu3 %vm137_vm12, %v925_v16 }
 0x9aa   :  { %v904_v18 = vpop.f32.mrf.mxu1 }
 0x9ab   :  { %v926_v19 = vmul.f32 %v920_v17, %v904_v18 }
 0x9ad   :  { %1133 = vmatmul.msk.f32.gmra.mxu3 %vm137_vm12, %v926_v19 }
 0x9b2   :  { %v907_v21 = vpop.f32.mrf.mxu1 }
 0x9b3   :  { %v927_v22 = vmul.f32 %v921_v20, %v907_v21 }
 0x9b5   :  { %1134 = vmatmul.msk.f32.gmra.mxu3 %vm137_vm12, %v927_v22 }
 0x9ba   :  { %v910_v24 = vpop.f32.mrf.mxu1 }
 0x9bb   :  { %v928_v25 = vmul.f32 %v922_v23, %v910_v24 }
 0x9bd   :  { %1135 = vmatmul.msk.f32.gmra.mxu3 %vm137_vm12, %v928_v25 }
 0x9c2   :  { %v913_v26 = vpop.f32.mrf.mxu1 }
 0x9c3   :  { %v929_v27 = vmul.f32 %v923_v13, %v913_v26 }
 0x9c5   :  { %1136 = vmatmul.msk.f32.gmra.mxu3 %vm137_vm12, %v929_v27 }
 0x9ca   :  { %v916_v28 = vpop.f32.mrf.mxu1 }
 0x9cb   :  { %v930_v29 = vmul.f32 %v924_v12, %v916_v28 }
 0x9cd   :  { %1137 = vmatmul.msk.f32.gmra.mxu3 %vm137_vm12, %v930_v29  ;;  %vm1107_vm12 = vcmask 9216  }
 0xa28   :  { %v985_v30 = vpop.f32.mrf.mxu3 }
 0xa30   :  { %v988_v31 = vpop.f32.mrf.mxu3 }
 0xa38   :  { %v991_v32 = vpop.f32.mrf.mxu3 }
 0xa40   :  { %v994_v33 = vpop.f32.mrf.mxu3 }
 0xa48   :  { %v997_v34 = vpop.f32.mrf.mxu3 }
 0xa50   :  { %v1000_v35 = vpop.f32.mrf.mxu3 }
 0xa51   :  { %1053 = vmatpush.msrb.mxu0 %v1000_v35 }
 0xa53   :  { %1054 = vmatpush.msrb.mxu0 %v997_v34 }
 0xa55   :  { %1055 = vmatpush.msrb.mxu0 %v994_v33 }
 0xa57   :  { %1056 = vmatpush.msrb.mxu0 %v991_v32 }
 0xa59   :  { %1057 = vmatpush.msrb.mxu0 %v988_v31 }
 0xa5b   :  { %1058 = vmatpush.msrb.mxu0 %v985_v30 }
 0xa5c   :  { %1138 = vmatmul.msk.f32.vlgmr.msrb.gmra.mxu0 %vm584_vm3, %v1003_v37 }
 0xa64   :  { %1139 = vmatmul.msk.f32.gmra.mxu0 %vm584_vm3, %v1004_v38 }
 0xa6c   :  { %1140 = vmatmul.msk.f32.gmra.mxu0 %vm584_vm3, %v1005_v39 }
 0xa74   :  { %1141 = vmatmul.msk.f32.gmra.mxu0 %vm584_vm3, %v1006_v40 }
 0xad9   :  { %v1060_v41 = vpop.f32.mrf.mxu0 }
 0xada   :  { %v1061_v51 = vadd.f32 %v1060_v41, %v1014_v50 }
 0xadc   :  { %v1072_v54 = vmax.f32 %v1061_v51, 0.0 }
 0xae1   :  { %v1063_v42 = vpop.f32.mrf.mxu0 }
 0xae2   :  { %v1064_v48 = vadd.f32 %v1063_v42, %v1019_v0 }
 0xae4   :  { %v1073_v53 = vmax.f32 %v1064_v48, 0.0 }
 0xae9   :  { %v1066_v43 = vpop.f32.mrf.mxu0 }
 0xaea   :  { %v1067_v46 = vadd.f32 %v1066_v43, %v1024_v44 }
 0xaec   :  { %v1074_v52 = vmax.f32 %v1067_v46, 0.0 }
 0xaf1   :  { %v1069_v45 = vpop.f32.mrf.mxu0 }
 0xaf2   :  { %v1070_v47 = vadd.f32 %v1069_v45, %v1029_v1 }
 0xaf4   :  { %v1075_v49 = vmax.f32 %v1070_v47, 0.0 }
 0xaf6   :  { %1099 = vmatpush.msra.mxu3 %v1075_v49 }
 0xaf8   :  { %1100 = vmatpush.msra.mxu3 %v1074_v52 }
 0xafa   :  { %1101 = vmatpush.msra.mxu3 %v1073_v53 }
 0xafc   :  { %1102 = vmatpush.msra.mxu3 %v1072_v54 }
 0xafd   :  { %1142 = vmatmul.msk.f32.vlgmr.msra.gmra.mxu3 %vm1083_vm11, %v1076_v55 }
 0xb80   :  { %v1104_v57 = vpop.f32.mrf.mxu3 }
 0xb81   :  { %v1105_v58 = vadd.f32 %v1104_v57, %v1081_v56 }
 0xb83   :  { %1108 = vst.msk [vmem:[%s1780_s22] sm:$0x3] %vm1107_vm12, %v1105_v58 }
 0xb84   :  { %1113 = vsyncpa [#allocation3], 1 }
 0xb85   :  { %1114 = vsyncpa [#allocation5], 1 }

</bundles_post_ra>
